<compile_context>
chip_gen: v6e
topology: v6e:2x2x1
jax: 0.10.0
libtpu: 0.0.40
codegen_flags: <defaults>
</compile_context>

<pallas_src>
import functools
import math

import jax
import jax.numpy as jnp
from jax import lax
from jax.experimental import pallas as pl
from jax.experimental.pallas import tpu as pltpu


# ---------------------------------------------------------------------------
# Config
# ---------------------------------------------------------------------------

class ViTConfig:
    image_size = 32
    patch_size = 16
    num_channels = 3
    hidden_size = 32
    num_layers = 2
    num_heads = 2
    mlp_dim = 128
    head_dim_hidden = 128   # custom classifier hidden width
    eps = 1e-12


# ---------------------------------------------------------------------------
# In-kernel helpers
# ---------------------------------------------------------------------------

def _bf16_dot(a, b):
    """MXU matmul with bf16 operands, f32 accumulation."""
    return jnp.dot(a.astype(jnp.bfloat16), b.astype(jnp.bfloat16),
                   preferred_element_type=jnp.float32)


def _ln(x, g, b, eps):
    mu = jnp.mean(x, axis=-1, keepdims=True)
    var = jnp.mean(jnp.square(x - mu), axis=-1, keepdims=True)
    return (x - mu) * lax.rsqrt(var + eps) * g + b


# ---------------------------------------------------------------------------
# Single fused kernel: embed + all encoder layers + final LN + MLP head
#   grid = (batch,);  all weights resident in VMEM (constant index maps).
# ---------------------------------------------------------------------------

def _vit_kernel(p_ref, pw_ref, bp_ref,
                ln1g_ref, ln1b_ref, qkvw_ref, qkvb_ref,
                projw_ref, projb_ref, ln2g_ref, ln2b_ref,
                fc1w_ref, fc1b_ref, fc2w_ref, fc2b_ref,
                lng_ref, lnb_ref, w1_ref, b1_ref, w2_ref, b2_ref,
                o_ref, *, num_layers, num_heads, s_real, eps):
    # ----- patch embedding + CLS token + position embeddings -----
    # p_ref[0]: (S_pad, C*P*P); bp_ref already holds cls/pos/patch-bias rows.
    x = _bf16_dot(p_ref[0], pw_ref[...]) + bp_ref[...]          # (S_pad, H) f32

    S_pad, H = x.shape
    dh = H // num_heads
    scale = 1.0 / math.sqrt(dh)

    # Static mask over padded key positions, hoisted out of the layer loop.
    key_idx = lax.broadcasted_iota(jnp.int32, (S_pad, S_pad), 1)
    key_mask = key_idx < s_real

    # ----- transformer encoder (statically unrolled over layers) -----
    for l in range(num_layers):
        # attention block (pre-LN)
        h = _ln(x, ln1g_ref[l], ln1b_ref[l], eps)
        qkv = _bf16_dot(h, qkvw_ref[l]) + qkvb_ref[l]            # (S_pad, 3H)

        head_outs = []
        for hd in range(num_heads):                              # static unroll
            q = qkv[:, hd * dh:(hd + 1) * dh]
            k = qkv[:, H + hd * dh:H + (hd + 1) * dh]
            v = qkv[:, 2 * H + hd * dh:2 * H + (hd + 1) * dh]
            s = lax.dot_general(q.astype(jnp.bfloat16), k.astype(jnp.bfloat16),
                                (((1,), (1,)), ((), ())),
                                preferred_element_type=jnp.float32) * scale
            s = jnp.where(key_mask, s, -1e30)
            s = s - jnp.max(s, axis=-1, keepdims=True)
            p = jnp.exp(s)
            p = p * pl.reciprocal(jnp.sum(p, axis=-1, keepdims=True),
                                  approx=True)
            head_outs.append(
                jnp.dot(p.astype(jnp.bfloat16), v.astype(jnp.bfloat16),
                        preferred_element_type=jnp.float32))
        attn = jnp.concatenate(head_outs, axis=-1)               # (S_pad, H)

        x = x + _bf16_dot(attn, projw_ref[l]) + projb_ref[l]     # residual

        # MLP block (pre-LN)
        h2 = _ln(x, ln2g_ref[l], ln2b_ref[l], eps)
        h2 = _bf16_dot(h2, fc1w_ref[l]) + fc1b_ref[l]
        # TODO(synk): HF ViT uses exact erf-GELU; tanh-approx GELU used here.
        h2 = jax.nn.gelu(h2, approximate=True)
        h2 = _bf16_dot(h2, fc2w_ref[l]) + fc2b_ref[l]
        x = x + h2                                               # residual

    # ----- final LN + custom classifier head on the CLS token -----
    # (vit.classifier = Identity -> "logits" = post-LN CLS hidden state;
    #  adaptive_avg_pool2d over (1,1) is a no-op; Dropout is identity.)
    cls = _ln(x[0:1, :], lng_ref[...], lnb_ref[...], eps)        # (1, H)
    y = jnp.maximum(_bf16_dot(cls, w1_ref[...]) + b1_ref[...], 0.0)   # (1, 128)
    logit = _bf16_dot(y, w2_ref[...]) + b2_ref[...]              # (1, 1)

    # Lane-padded output tile (scalar broadcast); wrapper extracts [:, 0, 0].
    o_ref[0] = jnp.broadcast_to(logit, (1, o_ref.shape[-1]))


def vit_forward_fused(patches, patch_w, bias_pos, stacked,
                      ln_g, ln_b, w1, b1, w2, b2, *,
                      num_layers, num_heads, s_real, eps):
    B, S_pad, CPP = patches.shape
    H = patch_w.shape[1]
    L = num_layers
    M = stacked["fc1_w"].shape[-1]
    OUT_LANES = 128

    bmap3 = lambda b: (0, 0, 0)   # full-array 3-D weight blocks (resident)
    bmap2 = lambda b: (0, 0)      # full-array 2-D weight blocks (resident)

    out = pl.pallas_call(
        functools.partial(_vit_kernel, num_layers=num_layers,
                          num_heads=num_heads, s_real=s_real, eps=eps),
        out_shape=jax.ShapeDtypeStruct((B, 1, OUT_LANES), jnp.float32),
        grid=(B,),
        in_specs=[
            pl.BlockSpec((1, S_pad, CPP), lambda b: (b, 0, 0)),  # patches
            pl.BlockSpec((CPP, H), bmap2),                       # patch_w
            pl.BlockSpec((S_pad, H), bmap2),                     # bias_pos
            pl.BlockSpec((L, 1, H), bmap3),                      # ln1_g
            pl.BlockSpec((L, 1, H), bmap3),                      # ln1_b
            pl.BlockSpec((L, H, 3 * H), bmap3),                  # qkv_w
            pl.BlockSpec((L, 1, 3 * H), bmap3),                  # qkv_b
            pl.BlockSpec((L, H, H), bmap3),                      # proj_w
            pl.BlockSpec((L, 1, H), bmap3),                      # proj_b
            pl.BlockSpec((L, 1, H), bmap3),                      # ln2_g
            pl.BlockSpec((L, 1, H), bmap3),                      # ln2_b
            pl.BlockSpec((L, H, M), bmap3),                      # fc1_w
            pl.BlockSpec((L, 1, M), bmap3),                      # fc1_b
            pl.BlockSpec((L, M, H), bmap3),                      # fc2_w
            pl.BlockSpec((L, 1, H), bmap3),                      # fc2_b
            pl.BlockSpec((1, H), bmap2),                         # final ln_g
            pl.BlockSpec((1, H), bmap2),                         # final ln_b
            pl.BlockSpec((H, w1.shape[1]), bmap2),               # head1_w
            pl.BlockSpec((1, w1.shape[1]), bmap2),               # head1_b
            pl.BlockSpec((w1.shape[1], 1), bmap2),               # head2_w
            pl.BlockSpec((1, 1), bmap2),                         # head2_b
        ],
        out_specs=pl.BlockSpec((1, 1, OUT_LANES), lambda b: (b, 0, 0)),
        compiler_params=pltpu.CompilerParams(
            dimension_semantics=("parallel",)),
    )(patches, patch_w, bias_pos,
      stacked["ln1_g"], stacked["ln1_b"], stacked["qkv_w"], stacked["qkv_b"],
      stacked["proj_w"], stacked["proj_b"], stacked["ln2_g"], stacked["ln2_b"],
      stacked["fc1_w"], stacked["fc1_b"], stacked["fc2_w"], stacked["fc2_b"],
      ln_g, ln_b, w1, b1, w2, b2)
    return out[:, 0, 0]                                          # (B,)


# ---------------------------------------------------------------------------
# Parameters (synthetic, deterministic; replaces the pretrained checkpoint)
# ---------------------------------------------------------------------------

def init_params(key, cfg):
    keys = iter(jax.random.split(key, 64))

    def dense(*shape):
        return jax.random.normal(next(keys), shape, jnp.float32) * 0.02

    H = cfg.hidden_size
    P = cfg.patch_size
    C = cfg.num_channels
    M = cfg.mlp_dim
    L = cfg.num_layers
    HD = cfg.head_dim_hidden
    num_patches = (cfg.image_size // P) ** 2

    params = {
        # patch-embedding conv (hidden, C, P, P) stored as (C*P*P, hidden)
        "patch_w": dense(C * P * P, H),
        "patch_b": jnp.zeros((H,), jnp.float32),
        "cls": dense(1, H),
        "pos": dense(num_patches + 1, H),
        "ln_g": jnp.ones((H,), jnp.float32),
        "ln_b": jnp.zeros((H,), jnp.float32),
        # classifier head: Dropout -> Linear(H,128) -> ReLU -> Dropout -> Linear(128,1)
        "head1_w": dense(H, HD),
        "head1_b": jnp.zeros((HD,), jnp.float32),
        "head2_w": dense(HD, 1),
        "head2_b": jnp.zeros((1,), jnp.float32),
        # encoder layers, stacked along a leading layer axis
        "stacked": {
            "ln1_g": jnp.ones((L, 1, H), jnp.float32),
            "ln1_b": jnp.zeros((L, 1, H), jnp.float32),
            "qkv_w": dense(L, H, 3 * H),
            "qkv_b": jnp.zeros((L, 1, 3 * H), jnp.float32),
            "proj_w": dense(L, H, H),
            "proj_b": jnp.zeros((L, 1, H), jnp.float32),
            "ln2_g": jnp.ones((L, 1, H), jnp.float32),
            "ln2_b": jnp.zeros((L, 1, H), jnp.float32),
            "fc1_w": dense(L, H, M),
            "fc1_b": jnp.zeros((L, 1, M), jnp.float32),
            "fc2_w": dense(L, M, H),
            "fc2_b": jnp.zeros((L, 1, H), jnp.float32),
        },
    }
    return params


# ---------------------------------------------------------------------------
# Forward pass (wrapper: patchify + bias precombine + one pallas_call)
# ---------------------------------------------------------------------------

def custom_vit_forward(params, pixel_values, cfg):
    B, C, Himg, Wimg = pixel_values.shape
    P = cfg.patch_size
    H = cfg.hidden_size
    Hp, Wp = Himg // P, Wimg // P
    Np = Hp * Wp
    S = Np + 1                              # real sequence length (CLS + patches)
    S_pad = ((S + 7) // 8) * 8              # pad rows to a multiple of 8 sublanes

    # --- patchify (pure data movement, once) and pad: row 0 = CLS slot, tail = pad
    x = pixel_values.reshape(B, C, Hp, P, Wp, P)
    patches = x.transpose(0, 2, 4, 1, 3, 5).reshape(B, Np, C * P * P)
    patches = jnp.pad(patches, ((0, 0), (1, S_pad - S), (0, 0)))      # (B, S_pad, CPP)

    # precombined bias: row0 = cls + pos0, rows 1..Np = patch_b + pos, pad rows = 0
    bias_pos = jnp.concatenate([
        params["cls"] + params["pos"][0:1, :],
        params["patch_b"][None, :] + params["pos"][1:, :],
        jnp.zeros((S_pad - S, H), jnp.float32),
    ], axis=0)                                                        # (S_pad, H)

    # --- single fused Pallas kernel for the whole network
    out = vit_forward_fused(
        patches, params["patch_w"], bias_pos, params["stacked"],
        params["ln_g"].reshape(1, H), params["ln_b"].reshape(1, H),
        params["head1_w"], params["head1_b"].reshape(1, -1),
        params["head2_w"], params["head2_b"].reshape(1, -1),
        num_layers=cfg.num_layers, num_heads=cfg.num_heads,
        s_real=S, eps=cfg.eps)                                        # (B,)
    return out


if __name__ == "__main__":
    cfg = ViTConfig()
    params = init_params(jax.random.PRNGKey(1), cfg)
    pixel_values = jax.random.normal(
        jax.random.PRNGKey(0),
        (2, cfg.num_channels, cfg.image_size, cfg.image_size),
        jnp.float32,
    )
    fwd = jax.jit(functools.partial(custom_vit_forward, cfg=cfg))
    out = fwd(params, pixel_values)
    out = jax.block_until_ready(out)
    assert out.shape == (2,), out.shape
    assert bool(jnp.all(jnp.isfinite(out)))
    print("KERNEL_OK")
</pallas_src>

<mosaic_0001>
module attributes {stable_mosaic.version = 11 : i64} {
  func.func @_vit_kernel(%arg0: i32, %arg1: memref<1x8x768xf32, #tpu.memory_space<vmem>>, %arg2: memref<768x32xf32, #tpu.memory_space<vmem>>, %arg3: memref<8x32xf32, #tpu.memory_space<vmem>>, %arg4: memref<2x1x32xf32, #tpu.memory_space<vmem>>, %arg5: memref<2x1x32xf32, #tpu.memory_space<vmem>>, %arg6: memref<2x32x96xf32, #tpu.memory_space<vmem>>, %arg7: memref<2x1x96xf32, #tpu.memory_space<vmem>>, %arg8: memref<2x32x32xf32, #tpu.memory_space<vmem>>, %arg9: memref<2x1x32xf32, #tpu.memory_space<vmem>>, %arg10: memref<2x1x32xf32, #tpu.memory_space<vmem>>, %arg11: memref<2x1x32xf32, #tpu.memory_space<vmem>>, %arg12: memref<2x32x128xf32, #tpu.memory_space<vmem>>, %arg13: memref<2x1x128xf32, #tpu.memory_space<vmem>>, %arg14: memref<2x128x32xf32, #tpu.memory_space<vmem>>, %arg15: memref<2x1x32xf32, #tpu.memory_space<vmem>>, %arg16: memref<1x32xf32, #tpu.memory_space<vmem>>, %arg17: memref<1x32xf32, #tpu.memory_space<vmem>>, %arg18: memref<32x128xf32, #tpu.memory_space<vmem>>, %arg19: memref<1x128xf32, #tpu.memory_space<vmem>>, %arg20: memref<128x1xf32, #tpu.memory_space<vmem>>, %arg21: memref<1x1xf32, #tpu.memory_space<vmem>>, %arg22: memref<1x1x128xf32, #tpu.memory_space<vmem>>) attributes {dimension_semantics = [#tpu.dimension_semantics<parallel>], iteration_bounds = array<i64: 2>, scalar_prefetch = 0 : i64, scratch_operands = 0 : i64, tpu.core_type = #tpu.core_type<tc>, window_params = [{transform_indices = @transform_0, window_bounds = array<i64: 1, 8, 768>}, {pipeline_mode = #tpu.pipeline_mode<synchronous>, transform_indices = @transform_1, window_bounds = array<i64: 768, 32>}, {pipeline_mode = #tpu.pipeline_mode<synchronous>, transform_indices = @transform_2, window_bounds = array<i64: 8, 32>}, {pipeline_mode = #tpu.pipeline_mode<synchronous>, transform_indices = @transform_3, window_bounds = array<i64: 2, 1, 32>}, {pipeline_mode = #tpu.pipeline_mode<synchronous>, transform_indices = @transform_4, window_bounds = array<i64: 2, 1, 32>}, {pipeline_mode = #tpu.pipeline_mode<synchronous>, transform_indices = @transform_5, window_bounds = array<i64: 2, 32, 96>}, {pipeline_mode = #tpu.pipeline_mode<synchronous>, transform_indices = @transform_6, window_bounds = array<i64: 2, 1, 96>}, {pipeline_mode = #tpu.pipeline_mode<synchronous>, transform_indices = @transform_7, window_bounds = array<i64: 2, 32, 32>}, {pipeline_mode = #tpu.pipeline_mode<synchronous>, transform_indices = @transform_8, window_bounds = array<i64: 2, 1, 32>}, {pipeline_mode = #tpu.pipeline_mode<synchronous>, transform_indices = @transform_9, window_bounds = array<i64: 2, 1, 32>}, {pipeline_mode = #tpu.pipeline_mode<synchronous>, transform_indices = @transform_10, window_bounds = array<i64: 2, 1, 32>}, {pipeline_mode = #tpu.pipeline_mode<synchronous>, transform_indices = @transform_11, window_bounds = array<i64: 2, 32, 128>}, {pipeline_mode = #tpu.pipeline_mode<synchronous>, transform_indices = @transform_12, window_bounds = array<i64: 2, 1, 128>}, {pipeline_mode = #tpu.pipeline_mode<synchronous>, transform_indices = @transform_13, window_bounds = array<i64: 2, 128, 32>}, {pipeline_mode = #tpu.pipeline_mode<synchronous>, transform_indices = @transform_14, window_bounds = array<i64: 2, 1, 32>}, {pipeline_mode = #tpu.pipeline_mode<synchronous>, transform_indices = @transform_15, window_bounds = array<i64: 1, 32>}, {pipeline_mode = #tpu.pipeline_mode<synchronous>, transform_indices = @transform_16, window_bounds = array<i64: 1, 32>}, {pipeline_mode = #tpu.pipeline_mode<synchronous>, transform_indices = @transform_17, window_bounds = array<i64: 32, 128>}, {pipeline_mode = #tpu.pipeline_mode<synchronous>, transform_indices = @transform_18, window_bounds = array<i64: 1, 128>}, {pipeline_mode = #tpu.pipeline_mode<synchronous>, transform_indices = @transform_19, window_bounds = array<i64: 128, 1>}, {pipeline_mode = #tpu.pipeline_mode<synchronous>, transform_indices = @transform_20, window_bounds = array<i64: 1, 1>}, {transform_indices = @transform_21, window_bounds = array<i64: 1, 1, 128>}]} {
    %c0 = arith.constant 0 : index
    %c0_0 = arith.constant 0 : index
    %c0_1 = arith.constant 0 : index
    %0 = vector.load %arg1[%c0, %c0_0, %c0_1] : memref<1x8x768xf32, #tpu.memory_space<vmem>>, vector<1x8x768xf32>
    %1 = vector.shape_cast %0 : vector<1x8x768xf32> to vector<8x768xf32>
    %c0_2 = arith.constant 0 : index
    %c0_3 = arith.constant 0 : index
    %2 = vector.load %arg2[%c0_2, %c0_3] : memref<768x32xf32, #tpu.memory_space<vmem>>, vector<768x32xf32>
    %3 = arith.truncf %1 : vector<8x768xf32> to vector<8x768xbf16>
    %4 = arith.truncf %2 : vector<768x32xf32> to vector<768x32xbf16>
    %cst = arith.constant dense<0.000000e+00> : vector<8x32xf32>
    %5 = tpu.matmul %3, %4, %cst {dimension_numbers = #tpu.dot_dimension_numbers<[1], [0], [0], [1], [0, 0, 1, 1], [], []>} : vector<8x768xbf16>, vector<768x32xbf16>, vector<8x32xf32> -> vector<8x32xf32>
    %c0_4 = arith.constant 0 : index
    %c0_5 = arith.constant 0 : index
    %6 = vector.load %arg3[%c0_4, %c0_5] : memref<8x32xf32, #tpu.memory_space<vmem>>, vector<8x32xf32>
    %7 = arith.addf %5, %6 : vector<8x32xf32>
    %8 = tpu.iota {dimensions = array<i32: 1>} : vector<8x8xi32>
    %c5_i32 = arith.constant 5 : i32
    %9 = vector.broadcast %c5_i32 : i32 to vector<8x8xi32>
    %10 = arith.cmpi slt, %8, %9 : vector<8x8xi32>
    %c0_6 = arith.constant 0 : index
    %c0_7 = arith.constant 0 : index
    %c0_8 = arith.constant 0 : index
    %11 = vector.load %arg4[%c0_6, %c0_7, %c0_8] : memref<2x1x32xf32, #tpu.memory_space<vmem>>, vector<1x1x32xf32>
    %12 = vector.shape_cast %11 : vector<1x1x32xf32> to vector<1x32xf32>
    %c0_9 = arith.constant 0 : index
    %c0_10 = arith.constant 0 : index
    %c0_11 = arith.constant 0 : index
    %13 = vector.load %arg5[%c0_9, %c0_10, %c0_11] : memref<2x1x32xf32, #tpu.memory_space<vmem>>, vector<1x1x32xf32>
    %14 = vector.shape_cast %13 : vector<1x1x32xf32> to vector<1x32xf32>
    %cst_12 = arith.constant dense<0.000000e+00> : vector<8xf32>
    %15 = vector.multi_reduction <add>, %7, %cst_12 [1] : vector<8x32xf32> to vector<8xf32>
    %16 = vector.shape_cast %15 : vector<8xf32> to vector<8x1xf32>
    %cst_13 = arith.constant 3.200000e+01 : f32
    %17 = vector.broadcast %cst_13 : f32 to vector<8x1xf32>
    %18 = arith.divf %16, %17 : vector<8x1xf32>
    %19 = vector.broadcast %18 : vector<8x1xf32> to vector<8x32xf32>
    %20 = arith.subf %7, %19 : vector<8x32xf32>
    %21 = arith.mulf %20, %20 : vector<8x32xf32>
    %cst_14 = arith.constant dense<0.000000e+00> : vector<8xf32>
    %22 = vector.multi_reduction <add>, %21, %cst_14 [1] : vector<8x32xf32> to vector<8xf32>
    %23 = vector.shape_cast %22 : vector<8xf32> to vector<8x1xf32>
    %cst_15 = arith.constant 3.200000e+01 : f32
    %24 = vector.broadcast %cst_15 : f32 to vector<8x1xf32>
    %25 = arith.divf %23, %24 : vector<8x1xf32>
    %26 = vector.broadcast %18 : vector<8x1xf32> to vector<8x32xf32>
    %27 = arith.subf %7, %26 : vector<8x32xf32>
    %cst_16 = arith.constant 9.99999996E-13 : f32
    %28 = vector.broadcast %cst_16 : f32 to vector<8x1xf32>
    %29 = arith.addf %25, %28 : vector<8x1xf32>
    %30 = math.rsqrt %29 : vector<8x1xf32>
    %31 = vector.broadcast %30 : vector<8x1xf32> to vector<8x32xf32>
    %32 = arith.mulf %27, %31 : vector<8x32xf32>
    %33 = vector.broadcast %12 : vector<1x32xf32> to vector<8x32xf32>
    %34 = arith.mulf %32, %33 : vector<8x32xf32>
    %35 = vector.broadcast %14 : vector<1x32xf32> to vector<8x32xf32>
    %36 = arith.addf %34, %35 : vector<8x32xf32>
    %c0_17 = arith.constant 0 : index
    %c0_18 = arith.constant 0 : index
    %c0_19 = arith.constant 0 : index
    %37 = vector.load %arg6[%c0_17, %c0_18, %c0_19] : memref<2x32x96xf32, #tpu.memory_space<vmem>>, vector<1x32x96xf32>
    %38 = vector.shape_cast %37 : vector<1x32x96xf32> to vector<32x96xf32>
    %39 = arith.truncf %36 : vector<8x32xf32> to vector<8x32xbf16>
    %40 = arith.truncf %38 : vector<32x96xf32> to vector<32x96xbf16>
    %cst_20 = arith.constant dense<0.000000e+00> : vector<8x96xf32>
    %41 = tpu.matmul %39, %40, %cst_20 {dimension_numbers = #tpu.dot_dimension_numbers<[1], [0], [0], [1], [0, 0, 1, 1], [], []>} : vector<8x32xbf16>, vector<32x96xbf16>, vector<8x96xf32> -> vector<8x96xf32>
    %c0_21 = arith.constant 0 : index
    %c0_22 = arith.constant 0 : index
    %c0_23 = arith.constant 0 : index
    %42 = vector.load %arg7[%c0_21, %c0_22, %c0_23] : memref<2x1x96xf32, #tpu.memory_space<vmem>>, vector<1x1x96xf32>
    %43 = vector.shape_cast %42 : vector<1x1x96xf32> to vector<1x96xf32>
    %44 = vector.broadcast %43 : vector<1x96xf32> to vector<8x96xf32>
    %45 = arith.addf %41, %44 : vector<8x96xf32>
    %46 = vector.extract_strided_slice %45 {offsets = [0, 0], sizes = [8, 16], strides = [1, 1]} : vector<8x96xf32> to vector<8x16xf32>
    %47 = vector.extract_strided_slice %45 {offsets = [0, 32], sizes = [8, 16], strides = [1, 1]} : vector<8x96xf32> to vector<8x16xf32>
    %48 = vector.extract_strided_slice %45 {offsets = [0, 64], sizes = [8, 16], strides = [1, 1]} : vector<8x96xf32> to vector<8x16xf32>
    %49 = arith.truncf %46 : vector<8x16xf32> to vector<8x16xbf16>
    %50 = arith.truncf %47 : vector<8x16xf32> to vector<8x16xbf16>
    %cst_24 = arith.constant dense<0.000000e+00> : vector<8x8xf32>
    %51 = tpu.matmul %49, %50, %cst_24 {dimension_numbers = #tpu.dot_dimension_numbers<[1], [1], [0], [0], [0, 0, 1, 0], [], []>} : vector<8x16xbf16>, vector<8x16xbf16>, vector<8x8xf32> -> vector<8x8xf32>
    %cst_25 = arith.constant 2.500000e-01 : f32
    %52 = vector.broadcast %cst_25 : f32 to vector<8x8xf32>
    %53 = arith.mulf %51, %52 : vector<8x8xf32>
    %cst_26 = arith.constant -1.000000e+30 : f32
    %54 = vector.broadcast %cst_26 : f32 to vector<8x8xf32>
    %55 = arith.select %10, %53, %54 : vector<8x8xi1>, vector<8x8xf32>
    %cst_27 = arith.constant dense<0xFF800000> : vector<8xf32>
    %56 = vector.multi_reduction <maximumf>, %55, %cst_27 [1] : vector<8x8xf32> to vector<8xf32>
    %57 = vector.shape_cast %56 : vector<8xf32> to vector<8x1xf32>
    %58 = vector.broadcast %57 : vector<8x1xf32> to vector<8x8xf32>
    %59 = arith.subf %55, %58 : vector<8x8xf32>
    %60 = math.exp %59 : vector<8x8xf32>
    %cst_28 = arith.constant dense<0.000000e+00> : vector<8xf32>
    %61 = vector.multi_reduction <add>, %60, %cst_28 [1] : vector<8x8xf32> to vector<8xf32>
    %62 = vector.shape_cast %61 : vector<8xf32> to vector<8x1xf32>
    %63 = tpu.reciprocal %62 {approx = true} : vector<8x1xf32> -> vector<8x1xf32>
    %64 = vector.broadcast %63 : vector<8x1xf32> to vector<8x8xf32>
    %65 = arith.mulf %60, %64 : vector<8x8xf32>
    %66 = arith.truncf %65 : vector<8x8xf32> to vector<8x8xbf16>
    %67 = arith.truncf %48 : vector<8x16xf32> to vector<8x16xbf16>
    %cst_29 = arith.constant dense<0.000000e+00> : vector<8x16xf32>
    %68 = tpu.matmul %66, %67, %cst_29 {dimension_numbers = #tpu.dot_dimension_numbers<[1], [0], [0], [1], [0, 0, 1, 1], [], []>} : vector<8x8xbf16>, vector<8x16xbf16>, vector<8x16xf32> -> vector<8x16xf32>
    %69 = vector.extract_strided_slice %45 {offsets = [0, 16], sizes = [8, 16], strides = [1, 1]} : vector<8x96xf32> to vector<8x16xf32>
    %70 = vector.extract_strided_slice %45 {offsets = [0, 48], sizes = [8, 16], strides = [1, 1]} : vector<8x96xf32> to vector<8x16xf32>
    %71 = vector.extract_strided_slice %45 {offsets = [0, 80], sizes = [8, 16], strides = [1, 1]} : vector<8x96xf32> to vector<8x16xf32>
    %72 = arith.truncf %69 : vector<8x16xf32> to vector<8x16xbf16>
    %73 = arith.truncf %70 : vector<8x16xf32> to vector<8x16xbf16>
    %cst_30 = arith.constant dense<0.000000e+00> : vector<8x8xf32>
    %74 = tpu.matmul %72, %73, %cst_30 {dimension_numbers = #tpu.dot_dimension_numbers<[1], [1], [0], [0], [0, 0, 1, 0], [], []>} : vector<8x16xbf16>, vector<8x16xbf16>, vector<8x8xf32> -> vector<8x8xf32>
    %cst_31 = arith.constant 2.500000e-01 : f32
    %75 = vector.broadcast %cst_31 : f32 to vector<8x8xf32>
    %76 = arith.mulf %74, %75 : vector<8x8xf32>
    %cst_32 = arith.constant -1.000000e+30 : f32
    %77 = vector.broadcast %cst_32 : f32 to vector<8x8xf32>
    %78 = arith.select %10, %76, %77 : vector<8x8xi1>, vector<8x8xf32>
    %cst_33 = arith.constant dense<0xFF800000> : vector<8xf32>
    %79 = vector.multi_reduction <maximumf>, %78, %cst_33 [1] : vector<8x8xf32> to vector<8xf32>
    %80 = vector.shape_cast %79 : vector<8xf32> to vector<8x1xf32>
    %81 = vector.broadcast %80 : vector<8x1xf32> to vector<8x8xf32>
    %82 = arith.subf %78, %81 : vector<8x8xf32>
    %83 = math.exp %82 : vector<8x8xf32>
    %cst_34 = arith.constant dense<0.000000e+00> : vector<8xf32>
    %84 = vector.multi_reduction <add>, %83, %cst_34 [1] : vector<8x8xf32> to vector<8xf32>
    %85 = vector.shape_cast %84 : vector<8xf32> to vector<8x1xf32>
    %86 = tpu.reciprocal %85 {approx = true} : vector<8x1xf32> -> vector<8x1xf32>
    %87 = vector.broadcast %86 : vector<8x1xf32> to vector<8x8xf32>
    %88 = arith.mulf %83, %87 : vector<8x8xf32>
    %89 = arith.truncf %88 : vector<8x8xf32> to vector<8x8xbf16>
    %90 = arith.truncf %71 : vector<8x16xf32> to vector<8x16xbf16>
    %cst_35 = arith.constant dense<0.000000e+00> : vector<8x16xf32>
    %91 = tpu.matmul %89, %90, %cst_35 {dimension_numbers = #tpu.dot_dimension_numbers<[1], [0], [0], [1], [0, 0, 1, 1], [], []>} : vector<8x8xbf16>, vector<8x16xbf16>, vector<8x16xf32> -> vector<8x16xf32>
    %92 = tpu.concatenate %68, %91 in 1 : vector<8x16xf32>, vector<8x16xf32> -> vector<8x32xf32>
    %c0_36 = arith.constant 0 : index
    %c0_37 = arith.constant 0 : index
    %c0_38 = arith.constant 0 : index
    %93 = vector.load %arg8[%c0_36, %c0_37, %c0_38] : memref<2x32x32xf32, #tpu.memory_space<vmem>>, vector<1x32x32xf32>
    %94 = vector.shape_cast %93 : vector<1x32x32xf32> to vector<32x32xf32>
    %95 = arith.truncf %92 : vector<8x32xf32> to vector<8x32xbf16>
    %96 = arith.truncf %94 : vector<32x32xf32> to vector<32x32xbf16>
    %cst_39 = arith.constant dense<0.000000e+00> : vector<8x32xf32>
    %97 = tpu.matmul %95, %96, %cst_39 {dimension_numbers = #tpu.dot_dimension_numbers<[1], [0], [0], [1], [0, 0, 1, 1], [], []>} : vector<8x32xbf16>, vector<32x32xbf16>, vector<8x32xf32> -> vector<8x32xf32>
    %98 = arith.addf %7, %97 : vector<8x32xf32>
    %c0_40 = arith.constant 0 : index
    %c0_41 = arith.constant 0 : index
    %c0_42 = arith.constant 0 : index
    %99 = vector.load %arg9[%c0_40, %c0_41, %c0_42] : memref<2x1x32xf32, #tpu.memory_space<vmem>>, vector<1x1x32xf32>
    %100 = vector.shape_cast %99 : vector<1x1x32xf32> to vector<1x32xf32>
    %101 = vector.broadcast %100 : vector<1x32xf32> to vector<8x32xf32>
    %102 = arith.addf %98, %101 : vector<8x32xf32>
    %c0_43 = arith.constant 0 : index
    %c0_44 = arith.constant 0 : index
    %c0_45 = arith.constant 0 : index
    %103 = vector.load %arg10[%c0_43, %c0_44, %c0_45] : memref<2x1x32xf32, #tpu.memory_space<vmem>>, vector<1x1x32xf32>
    %104 = vector.shape_cast %103 : vector<1x1x32xf32> to vector<1x32xf32>
    %c0_46 = arith.constant 0 : index
    %c0_47 = arith.constant 0 : index
    %c0_48 = arith.constant 0 : index
    %105 = vector.load %arg11[%c0_46, %c0_47, %c0_48] : memref<2x1x32xf32, #tpu.memory_space<vmem>>, vector<1x1x32xf32>
    %106 = vector.shape_cast %105 : vector<1x1x32xf32> to vector<1x32xf32>
    %cst_49 = arith.constant dense<0.000000e+00> : vector<8xf32>
    %107 = vector.multi_reduction <add>, %102, %cst_49 [1] : vector<8x32xf32> to vector<8xf32>
    %108 = vector.shape_cast %107 : vector<8xf32> to vector<8x1xf32>
    %cst_50 = arith.constant 3.200000e+01 : f32
    %109 = vector.broadcast %cst_50 : f32 to vector<8x1xf32>
    %110 = arith.divf %108, %109 : vector<8x1xf32>
    %111 = vector.broadcast %110 : vector<8x1xf32> to vector<8x32xf32>
    %112 = arith.subf %102, %111 : vector<8x32xf32>
    %113 = arith.mulf %112, %112 : vector<8x32xf32>
    %cst_51 = arith.constant dense<0.000000e+00> : vector<8xf32>
    %114 = vector.multi_reduction <add>, %113, %cst_51 [1] : vector<8x32xf32> to vector<8xf32>
    %115 = vector.shape_cast %114 : vector<8xf32> to vector<8x1xf32>
    %cst_52 = arith.constant 3.200000e+01 : f32
    %116 = vector.broadcast %cst_52 : f32 to vector<8x1xf32>
    %117 = arith.divf %115, %116 : vector<8x1xf32>
    %118 = vector.broadcast %110 : vector<8x1xf32> to vector<8x32xf32>
    %119 = arith.subf %102, %118 : vector<8x32xf32>
    %cst_53 = arith.constant 9.99999996E-13 : f32
    %120 = vector.broadcast %cst_53 : f32 to vector<8x1xf32>
    %121 = arith.addf %117, %120 : vector<8x1xf32>
    %122 = math.rsqrt %121 : vector<8x1xf32>
    %123 = vector.broadcast %122 : vector<8x1xf32> to vector<8x32xf32>
    %124 = arith.mulf %119, %123 : vector<8x32xf32>
    %125 = vector.broadcast %104 : vector<1x32xf32> to vector<8x32xf32>
    %126 = arith.mulf %124, %125 : vector<8x32xf32>
    %127 = vector.broadcast %106 : vector<1x32xf32> to vector<8x32xf32>
    %128 = arith.addf %126, %127 : vector<8x32xf32>
    %c0_54 = arith.constant 0 : index
    %c0_55 = arith.constant 0 : index
    %c0_56 = arith.constant 0 : index
    %129 = vector.load %arg12[%c0_54, %c0_55, %c0_56] : memref<2x32x128xf32, #tpu.memory_space<vmem>>, vector<1x32x128xf32>
    %130 = vector.shape_cast %129 : vector<1x32x128xf32> to vector<32x128xf32>
    %131 = arith.truncf %128 : vector<8x32xf32> to vector<8x32xbf16>
    %132 = arith.truncf %130 : vector<32x128xf32> to vector<32x128xbf16>
    %cst_57 = arith.constant dense<0.000000e+00> : vector<8x128xf32>
    %133 = tpu.matmul %131, %132, %cst_57 {dimension_numbers = #tpu.dot_dimension_numbers<[1], [0], [0], [1], [0, 0, 1, 1], [], []>} : vector<8x32xbf16>, vector<32x128xbf16>, vector<8x128xf32> -> vector<8x128xf32>
    %c0_58 = arith.constant 0 : index
    %c0_59 = arith.constant 0 : index
    %c0_60 = arith.constant 0 : index
    %134 = vector.load %arg13[%c0_58, %c0_59, %c0_60] : memref<2x1x128xf32, #tpu.memory_space<vmem>>, vector<1x1x128xf32>
    %135 = vector.shape_cast %134 : vector<1x1x128xf32> to vector<1x128xf32>
    %136 = vector.broadcast %135 : vector<1x128xf32> to vector<8x128xf32>
    %137 = arith.addf %133, %136 : vector<8x128xf32>
    %138 = arith.mulf %137, %137 : vector<8x128xf32>
    %139 = arith.mulf %137, %138 : vector<8x128xf32>
    %cst_61 = arith.constant 4.471500e-02 : f32
    %140 = vector.broadcast %cst_61 : f32 to vector<8x128xf32>
    %141 = arith.mulf %140, %139 : vector<8x128xf32>
    %142 = arith.addf %137, %141 : vector<8x128xf32>
    %cst_62 = arith.constant 0.797884583 : f32
    %143 = vector.broadcast %cst_62 : f32 to vector<8x128xf32>
    %144 = arith.mulf %143, %142 : vector<8x128xf32>
    %145 = math.tanh %144 : vector<8x128xf32>
    %cst_63 = arith.constant 1.000000e+00 : f32
    %146 = vector.broadcast %cst_63 : f32 to vector<8x128xf32>
    %147 = arith.addf %146, %145 : vector<8x128xf32>
    %cst_64 = arith.constant 5.000000e-01 : f32
    %148 = vector.broadcast %cst_64 : f32 to vector<8x128xf32>
    %149 = arith.mulf %148, %147 : vector<8x128xf32>
    %150 = arith.mulf %137, %149 : vector<8x128xf32>
    %c0_65 = arith.constant 0 : index
    %c0_66 = arith.constant 0 : index
    %c0_67 = arith.constant 0 : index
    %151 = vector.load %arg14[%c0_65, %c0_66, %c0_67] : memref<2x128x32xf32, #tpu.memory_space<vmem>>, vector<1x128x32xf32>
    %152 = vector.shape_cast %151 : vector<1x128x32xf32> to vector<128x32xf32>
    %153 = arith.truncf %150 : vector<8x128xf32> to vector<8x128xbf16>
    %154 = arith.truncf %152 : vector<128x32xf32> to vector<128x32xbf16>
    %cst_68 = arith.constant dense<0.000000e+00> : vector<8x32xf32>
    %155 = tpu.matmul %153, %154, %cst_68 {dimension_numbers = #tpu.dot_dimension_numbers<[1], [0], [0], [1], [0, 0, 1, 1], [], []>} : vector<8x128xbf16>, vector<128x32xbf16>, vector<8x32xf32> -> vector<8x32xf32>
    %c0_69 = arith.constant 0 : index
    %c0_70 = arith.constant 0 : index
    %c0_71 = arith.constant 0 : index
    %156 = vector.load %arg15[%c0_69, %c0_70, %c0_71] : memref<2x1x32xf32, #tpu.memory_space<vmem>>, vector<1x1x32xf32>
    %157 = vector.shape_cast %156 : vector<1x1x32xf32> to vector<1x32xf32>
    %158 = vector.broadcast %157 : vector<1x32xf32> to vector<8x32xf32>
    %159 = arith.addf %155, %158 : vector<8x32xf32>
    %160 = arith.addf %102, %159 : vector<8x32xf32>
    %c1 = arith.constant 1 : index
    %c0_72 = arith.constant 0 : index
    %c0_73 = arith.constant 0 : index
    %161 = vector.load %arg4[%c1, %c0_72, %c0_73] : memref<2x1x32xf32, #tpu.memory_space<vmem>>, vector<1x1x32xf32>
    %162 = vector.shape_cast %161 : vector<1x1x32xf32> to vector<1x32xf32>
    %c1_74 = arith.constant 1 : index
    %c0_75 = arith.constant 0 : index
    %c0_76 = arith.constant 0 : index
    %163 = vector.load %arg5[%c1_74, %c0_75, %c0_76] : memref<2x1x32xf32, #tpu.memory_space<vmem>>, vector<1x1x32xf32>
    %164 = vector.shape_cast %163 : vector<1x1x32xf32> to vector<1x32xf32>
    %cst_77 = arith.constant dense<0.000000e+00> : vector<8xf32>
    %165 = vector.multi_reduction <add>, %160, %cst_77 [1] : vector<8x32xf32> to vector<8xf32>
    %166 = vector.shape_cast %165 : vector<8xf32> to vector<8x1xf32>
    %cst_78 = arith.constant 3.200000e+01 : f32
    %167 = vector.broadcast %cst_78 : f32 to vector<8x1xf32>
    %168 = arith.divf %166, %167 : vector<8x1xf32>
    %169 = vector.broadcast %168 : vector<8x1xf32> to vector<8x32xf32>
    %170 = arith.subf %160, %169 : vector<8x32xf32>
    %171 = arith.mulf %170, %170 : vector<8x32xf32>
    %cst_79 = arith.constant dense<0.000000e+00> : vector<8xf32>
    %172 = vector.multi_reduction <add>, %171, %cst_79 [1] : vector<8x32xf32> to vector<8xf32>
    %173 = vector.shape_cast %172 : vector<8xf32> to vector<8x1xf32>
    %cst_80 = arith.constant 3.200000e+01 : f32
    %174 = vector.broadcast %cst_80 : f32 to vector<8x1xf32>
    %175 = arith.divf %173, %174 : vector<8x1xf32>
    %176 = vector.broadcast %168 : vector<8x1xf32> to vector<8x32xf32>
    %177 = arith.subf %160, %176 : vector<8x32xf32>
    %cst_81 = arith.constant 9.99999996E-13 : f32
    %178 = vector.broadcast %cst_81 : f32 to vector<8x1xf32>
    %179 = arith.addf %175, %178 : vector<8x1xf32>
    %180 = math.rsqrt %179 : vector<8x1xf32>
    %181 = vector.broadcast %180 : vector<8x1xf32> to vector<8x32xf32>
    %182 = arith.mulf %177, %181 : vector<8x32xf32>
    %183 = vector.broadcast %162 : vector<1x32xf32> to vector<8x32xf32>
    %184 = arith.mulf %182, %183 : vector<8x32xf32>
    %185 = vector.broadcast %164 : vector<1x32xf32> to vector<8x32xf32>
    %186 = arith.addf %184, %185 : vector<8x32xf32>
    %c1_82 = arith.constant 1 : index
    %c0_83 = arith.constant 0 : index
    %c0_84 = arith.constant 0 : index
    %187 = vector.load %arg6[%c1_82, %c0_83, %c0_84] : memref<2x32x96xf32, #tpu.memory_space<vmem>>, vector<1x32x96xf32>
    %188 = vector.shape_cast %187 : vector<1x32x96xf32> to vector<32x96xf32>
    %189 = arith.truncf %186 : vector<8x32xf32> to vector<8x32xbf16>
    %190 = arith.truncf %188 : vector<32x96xf32> to vector<32x96xbf16>
    %cst_85 = arith.constant dense<0.000000e+00> : vector<8x96xf32>
    %191 = tpu.matmul %189, %190, %cst_85 {dimension_numbers = #tpu.dot_dimension_numbers<[1], [0], [0], [1], [0, 0, 1, 1], [], []>} : vector<8x32xbf16>, vector<32x96xbf16>, vector<8x96xf32> -> vector<8x96xf32>
    %c1_86 = arith.constant 1 : index
    %c0_87 = arith.constant 0 : index
    %c0_88 = arith.constant 0 : index
    %192 = vector.load %arg7[%c1_86, %c0_87, %c0_88] : memref<2x1x96xf32, #tpu.memory_space<vmem>>, vector<1x1x96xf32>
    %193 = vector.shape_cast %192 : vector<1x1x96xf32> to vector<1x96xf32>
    %194 = vector.broadcast %193 : vector<1x96xf32> to vector<8x96xf32>
    %195 = arith.addf %191, %194 : vector<8x96xf32>
    %196 = vector.extract_strided_slice %195 {offsets = [0, 0], sizes = [8, 16], strides = [1, 1]} : vector<8x96xf32> to vector<8x16xf32>
    %197 = vector.extract_strided_slice %195 {offsets = [0, 32], sizes = [8, 16], strides = [1, 1]} : vector<8x96xf32> to vector<8x16xf32>
    %198 = vector.extract_strided_slice %195 {offsets = [0, 64], sizes = [8, 16], strides = [1, 1]} : vector<8x96xf32> to vector<8x16xf32>
    %199 = arith.truncf %196 : vector<8x16xf32> to vector<8x16xbf16>
    %200 = arith.truncf %197 : vector<8x16xf32> to vector<8x16xbf16>
    %cst_89 = arith.constant dense<0.000000e+00> : vector<8x8xf32>
    %201 = tpu.matmul %199, %200, %cst_89 {dimension_numbers = #tpu.dot_dimension_numbers<[1], [1], [0], [0], [0, 0, 1, 0], [], []>} : vector<8x16xbf16>, vector<8x16xbf16>, vector<8x8xf32> -> vector<8x8xf32>
    %cst_90 = arith.constant 2.500000e-01 : f32
    %202 = vector.broadcast %cst_90 : f32 to vector<8x8xf32>
    %203 = arith.mulf %201, %202 : vector<8x8xf32>
    %cst_91 = arith.constant -1.000000e+30 : f32
    %204 = vector.broadcast %cst_91 : f32 to vector<8x8xf32>
    %205 = arith.select %10, %203, %204 : vector<8x8xi1>, vector<8x8xf32>
    %cst_92 = arith.constant dense<0xFF800000> : vector<8xf32>
    %206 = vector.multi_reduction <maximumf>, %205, %cst_92 [1] : vector<8x8xf32> to vector<8xf32>
    %207 = vector.shape_cast %206 : vector<8xf32> to vector<8x1xf32>
    %208 = vector.broadcast %207 : vector<8x1xf32> to vector<8x8xf32>
    %209 = arith.subf %205, %208 : vector<8x8xf32>
    %210 = math.exp %209 : vector<8x8xf32>
    %cst_93 = arith.constant dense<0.000000e+00> : vector<8xf32>
    %211 = vector.multi_reduction <add>, %210, %cst_93 [1] : vector<8x8xf32> to vector<8xf32>
    %212 = vector.shape_cast %211 : vector<8xf32> to vector<8x1xf32>
    %213 = tpu.reciprocal %212 {approx = true} : vector<8x1xf32> -> vector<8x1xf32>
    %214 = vector.broadcast %213 : vector<8x1xf32> to vector<8x8xf32>
    %215 = arith.mulf %210, %214 : vector<8x8xf32>
    %216 = arith.truncf %215 : vector<8x8xf32> to vector<8x8xbf16>
    %217 = arith.truncf %198 : vector<8x16xf32> to vector<8x16xbf16>
    %cst_94 = arith.constant dense<0.000000e+00> : vector<8x16xf32>
    %218 = tpu.matmul %216, %217, %cst_94 {dimension_numbers = #tpu.dot_dimension_numbers<[1], [0], [0], [1], [0, 0, 1, 1], [], []>} : vector<8x8xbf16>, vector<8x16xbf16>, vector<8x16xf32> -> vector<8x16xf32>
    %219 = vector.extract_strided_slice %195 {offsets = [0, 16], sizes = [8, 16], strides = [1, 1]} : vector<8x96xf32> to vector<8x16xf32>
    %220 = vector.extract_strided_slice %195 {offsets = [0, 48], sizes = [8, 16], strides = [1, 1]} : vector<8x96xf32> to vector<8x16xf32>
    %221 = vector.extract_strided_slice %195 {offsets = [0, 80], sizes = [8, 16], strides = [1, 1]} : vector<8x96xf32> to vector<8x16xf32>
    %222 = arith.truncf %219 : vector<8x16xf32> to vector<8x16xbf16>
    %223 = arith.truncf %220 : vector<8x16xf32> to vector<8x16xbf16>
    %cst_95 = arith.constant dense<0.000000e+00> : vector<8x8xf32>
    %224 = tpu.matmul %222, %223, %cst_95 {dimension_numbers = #tpu.dot_dimension_numbers<[1], [1], [0], [0], [0, 0, 1, 0], [], []>} : vector<8x16xbf16>, vector<8x16xbf16>, vector<8x8xf32> -> vector<8x8xf32>
    %cst_96 = arith.constant 2.500000e-01 : f32
    %225 = vector.broadcast %cst_96 : f32 to vector<8x8xf32>
    %226 = arith.mulf %224, %225 : vector<8x8xf32>
    %cst_97 = arith.constant -1.000000e+30 : f32
    %227 = vector.broadcast %cst_97 : f32 to vector<8x8xf32>
    %228 = arith.select %10, %226, %227 : vector<8x8xi1>, vector<8x8xf32>
    %cst_98 = arith.constant dense<0xFF800000> : vector<8xf32>
    %229 = vector.multi_reduction <maximumf>, %228, %cst_98 [1] : vector<8x8xf32> to vector<8xf32>
    %230 = vector.shape_cast %229 : vector<8xf32> to vector<8x1xf32>
    %231 = vector.broadcast %230 : vector<8x1xf32> to vector<8x8xf32>
    %232 = arith.subf %228, %231 : vector<8x8xf32>
    %233 = math.exp %232 : vector<8x8xf32>
    %cst_99 = arith.constant dense<0.000000e+00> : vector<8xf32>
    %234 = vector.multi_reduction <add>, %233, %cst_99 [1] : vector<8x8xf32> to vector<8xf32>
    %235 = vector.shape_cast %234 : vector<8xf32> to vector<8x1xf32>
    %236 = tpu.reciprocal %235 {approx = true} : vector<8x1xf32> -> vector<8x1xf32>
    %237 = vector.broadcast %236 : vector<8x1xf32> to vector<8x8xf32>
    %238 = arith.mulf %233, %237 : vector<8x8xf32>
    %239 = arith.truncf %238 : vector<8x8xf32> to vector<8x8xbf16>
    %240 = arith.truncf %221 : vector<8x16xf32> to vector<8x16xbf16>
    %cst_100 = arith.constant dense<0.000000e+00> : vector<8x16xf32>
    %241 = tpu.matmul %239, %240, %cst_100 {dimension_numbers = #tpu.dot_dimension_numbers<[1], [0], [0], [1], [0, 0, 1, 1], [], []>} : vector<8x8xbf16>, vector<8x16xbf16>, vector<8x16xf32> -> vector<8x16xf32>
    %242 = tpu.concatenate %218, %241 in 1 : vector<8x16xf32>, vector<8x16xf32> -> vector<8x32xf32>
    %c1_101 = arith.constant 1 : index
    %c0_102 = arith.constant 0 : index
    %c0_103 = arith.constant 0 : index
    %243 = vector.load %arg8[%c1_101, %c0_102, %c0_103] : memref<2x32x32xf32, #tpu.memory_space<vmem>>, vector<1x32x32xf32>
    %244 = vector.shape_cast %243 : vector<1x32x32xf32> to vector<32x32xf32>
    %245 = arith.truncf %242 : vector<8x32xf32> to vector<8x32xbf16>
    %246 = arith.truncf %244 : vector<32x32xf32> to vector<32x32xbf16>
    %cst_104 = arith.constant dense<0.000000e+00> : vector<8x32xf32>
    %247 = tpu.matmul %245, %246, %cst_104 {dimension_numbers = #tpu.dot_dimension_numbers<[1], [0], [0], [1], [0, 0, 1, 1], [], []>} : vector<8x32xbf16>, vector<32x32xbf16>, vector<8x32xf32> -> vector<8x32xf32>
    %248 = arith.addf %160, %247 : vector<8x32xf32>
    %c1_105 = arith.constant 1 : index
    %c0_106 = arith.constant 0 : index
    %c0_107 = arith.constant 0 : index
    %249 = vector.load %arg9[%c1_105, %c0_106, %c0_107] : memref<2x1x32xf32, #tpu.memory_space<vmem>>, vector<1x1x32xf32>
    %250 = vector.shape_cast %249 : vector<1x1x32xf32> to vector<1x32xf32>
    %251 = vector.broadcast %250 : vector<1x32xf32> to vector<8x32xf32>
    %252 = arith.addf %248, %251 : vector<8x32xf32>
    %c1_108 = arith.constant 1 : index
    %c0_109 = arith.constant 0 : index
    %c0_110 = arith.constant 0 : index
    %253 = vector.load %arg10[%c1_108, %c0_109, %c0_110] : memref<2x1x32xf32, #tpu.memory_space<vmem>>, vector<1x1x32xf32>
    %254 = vector.shape_cast %253 : vector<1x1x32xf32> to vector<1x32xf32>
    %c1_111 = arith.constant 1 : index
    %c0_112 = arith.constant 0 : index
    %c0_113 = arith.constant 0 : index
    %255 = vector.load %arg11[%c1_111, %c0_112, %c0_113] : memref<2x1x32xf32, #tpu.memory_space<vmem>>, vector<1x1x32xf32>
    %256 = vector.shape_cast %255 : vector<1x1x32xf32> to vector<1x32xf32>
    %cst_114 = arith.constant dense<0.000000e+00> : vector<8xf32>
    %257 = vector.multi_reduction <add>, %252, %cst_114 [1] : vector<8x32xf32> to vector<8xf32>
    %258 = vector.shape_cast %257 : vector<8xf32> to vector<8x1xf32>
    %cst_115 = arith.constant 3.200000e+01 : f32
    %259 = vector.broadcast %cst_115 : f32 to vector<8x1xf32>
    %260 = arith.divf %258, %259 : vector<8x1xf32>
    %261 = vector.broadcast %260 : vector<8x1xf32> to vector<8x32xf32>
    %262 = arith.subf %252, %261 : vector<8x32xf32>
    %263 = arith.mulf %262, %262 : vector<8x32xf32>
    %cst_116 = arith.constant dense<0.000000e+00> : vector<8xf32>
    %264 = vector.multi_reduction <add>, %263, %cst_116 [1] : vector<8x32xf32> to vector<8xf32>
    %265 = vector.shape_cast %264 : vector<8xf32> to vector<8x1xf32>
    %cst_117 = arith.constant 3.200000e+01 : f32
    %266 = vector.broadcast %cst_117 : f32 to vector<8x1xf32>
    %267 = arith.divf %265, %266 : vector<8x1xf32>
    %268 = vector.broadcast %260 : vector<8x1xf32> to vector<8x32xf32>
    %269 = arith.subf %252, %268 : vector<8x32xf32>
    %cst_118 = arith.constant 9.99999996E-13 : f32
    %270 = vector.broadcast %cst_118 : f32 to vector<8x1xf32>
    %271 = arith.addf %267, %270 : vector<8x1xf32>
    %272 = math.rsqrt %271 : vector<8x1xf32>
    %273 = vector.broadcast %272 : vector<8x1xf32> to vector<8x32xf32>
    %274 = arith.mulf %269, %273 : vector<8x32xf32>
    %275 = vector.broadcast %254 : vector<1x32xf32> to vector<8x32xf32>
    %276 = arith.mulf %274, %275 : vector<8x32xf32>
    %277 = vector.broadcast %256 : vector<1x32xf32> to vector<8x32xf32>
    %278 = arith.addf %276, %277 : vector<8x32xf32>
    %c1_119 = arith.constant 1 : index
    %c0_120 = arith.constant 0 : index
    %c0_121 = arith.constant 0 : index
    %279 = vector.load %arg12[%c1_119, %c0_120, %c0_121] : memref<2x32x128xf32, #tpu.memory_space<vmem>>, vector<1x32x128xf32>
    %280 = vector.shape_cast %279 : vector<1x32x128xf32> to vector<32x128xf32>
    %281 = arith.truncf %278 : vector<8x32xf32> to vector<8x32xbf16>
    %282 = arith.truncf %280 : vector<32x128xf32> to vector<32x128xbf16>
    %cst_122 = arith.constant dense<0.000000e+00> : vector<8x128xf32>
    %283 = tpu.matmul %281, %282, %cst_122 {dimension_numbers = #tpu.dot_dimension_numbers<[1], [0], [0], [1], [0, 0, 1, 1], [], []>} : vector<8x32xbf16>, vector<32x128xbf16>, vector<8x128xf32> -> vector<8x128xf32>
    %c1_123 = arith.constant 1 : index
    %c0_124 = arith.constant 0 : index
    %c0_125 = arith.constant 0 : index
    %284 = vector.load %arg13[%c1_123, %c0_124, %c0_125] : memref<2x1x128xf32, #tpu.memory_space<vmem>>, vector<1x1x128xf32>
    %285 = vector.shape_cast %284 : vector<1x1x128xf32> to vector<1x128xf32>
    %286 = vector.broadcast %285 : vector<1x128xf32> to vector<8x128xf32>
    %287 = arith.addf %283, %286 : vector<8x128xf32>
    %288 = arith.mulf %287, %287 : vector<8x128xf32>
    %289 = arith.mulf %287, %288 : vector<8x128xf32>
    %cst_126 = arith.constant 4.471500e-02 : f32
    %290 = vector.broadcast %cst_126 : f32 to vector<8x128xf32>
    %291 = arith.mulf %290, %289 : vector<8x128xf32>
    %292 = arith.addf %287, %291 : vector<8x128xf32>
    %cst_127 = arith.constant 0.797884583 : f32
    %293 = vector.broadcast %cst_127 : f32 to vector<8x128xf32>
    %294 = arith.mulf %293, %292 : vector<8x128xf32>
    %295 = math.tanh %294 : vector<8x128xf32>
    %cst_128 = arith.constant 1.000000e+00 : f32
    %296 = vector.broadcast %cst_128 : f32 to vector<8x128xf32>
    %297 = arith.addf %296, %295 : vector<8x128xf32>
    %cst_129 = arith.constant 5.000000e-01 : f32
    %298 = vector.broadcast %cst_129 : f32 to vector<8x128xf32>
    %299 = arith.mulf %298, %297 : vector<8x128xf32>
    %300 = arith.mulf %287, %299 : vector<8x128xf32>
    %c1_130 = arith.constant 1 : index
    %c0_131 = arith.constant 0 : index
    %c0_132 = arith.constant 0 : index
    %301 = vector.load %arg14[%c1_130, %c0_131, %c0_132] : memref<2x128x32xf32, #tpu.memory_space<vmem>>, vector<1x128x32xf32>
    %302 = vector.shape_cast %301 : vector<1x128x32xf32> to vector<128x32xf32>
    %303 = arith.truncf %300 : vector<8x128xf32> to vector<8x128xbf16>
    %304 = arith.truncf %302 : vector<128x32xf32> to vector<128x32xbf16>
    %cst_133 = arith.constant dense<0.000000e+00> : vector<8x32xf32>
    %305 = tpu.matmul %303, %304, %cst_133 {dimension_numbers = #tpu.dot_dimension_numbers<[1], [0], [0], [1], [0, 0, 1, 1], [], []>} : vector<8x128xbf16>, vector<128x32xbf16>, vector<8x32xf32> -> vector<8x32xf32>
    %c1_134 = arith.constant 1 : index
    %c0_135 = arith.constant 0 : index
    %c0_136 = arith.constant 0 : index
    %306 = vector.load %arg15[%c1_134, %c0_135, %c0_136] : memref<2x1x32xf32, #tpu.memory_space<vmem>>, vector<1x1x32xf32>
    %307 = vector.shape_cast %306 : vector<1x1x32xf32> to vector<1x32xf32>
    %308 = vector.broadcast %307 : vector<1x32xf32> to vector<8x32xf32>
    %309 = arith.addf %305, %308 : vector<8x32xf32>
    %310 = arith.addf %252, %309 : vector<8x32xf32>
    %311 = vector.extract_strided_slice %310 {offsets = [0, 0], sizes = [1, 32], strides = [1, 1]} : vector<8x32xf32> to vector<1x32xf32>
    %c0_137 = arith.constant 0 : index
    %c0_138 = arith.constant 0 : index
    %312 = vector.load %arg16[%c0_137, %c0_138] : memref<1x32xf32, #tpu.memory_space<vmem>>, vector<1x32xf32>
    %c0_139 = arith.constant 0 : index
    %c0_140 = arith.constant 0 : index
    %313 = vector.load %arg17[%c0_139, %c0_140] : memref<1x32xf32, #tpu.memory_space<vmem>>, vector<1x32xf32>
    %cst_141 = arith.constant dense<0.000000e+00> : vector<1xf32>
    %314 = vector.multi_reduction <add>, %311, %cst_141 [1] : vector<1x32xf32> to vector<1xf32>
    %315 = vector.shape_cast %314 : vector<1xf32> to vector<1x1xf32>
    %cst_142 = arith.constant 3.200000e+01 : f32
    %316 = vector.broadcast %cst_142 : f32 to vector<1x1xf32>
    %317 = arith.divf %315, %316 : vector<1x1xf32>
    %318 = vector.broadcast %317 : vector<1x1xf32> to vector<1x32xf32>
    %319 = arith.subf %311, %318 : vector<1x32xf32>
    %320 = arith.mulf %319, %319 : vector<1x32xf32>
    %cst_143 = arith.constant dense<0.000000e+00> : vector<1xf32>
    %321 = vector.multi_reduction <add>, %320, %cst_143 [1] : vector<1x32xf32> to vector<1xf32>
    %322 = vector.shape_cast %321 : vector<1xf32> to vector<1x1xf32>
    %cst_144 = arith.constant 3.200000e+01 : f32
    %323 = vector.broadcast %cst_144 : f32 to vector<1x1xf32>
    %324 = arith.divf %322, %323 : vector<1x1xf32>
    %325 = vector.broadcast %317 : vector<1x1xf32> to vector<1x32xf32>
    %326 = arith.subf %311, %325 : vector<1x32xf32>
    %cst_145 = arith.constant 9.99999996E-13 : f32
    %327 = vector.broadcast %cst_145 : f32 to vector<1x1xf32>
    %328 = arith.addf %324, %327 : vector<1x1xf32>
    %329 = math.rsqrt %328 : vector<1x1xf32>
    %330 = vector.broadcast %329 : vector<1x1xf32> to vector<1x32xf32>
    %331 = arith.mulf %326, %330 : vector<1x32xf32>
    %332 = arith.mulf %331, %312 : vector<1x32xf32>
    %333 = arith.addf %332, %313 : vector<1x32xf32>
    %c0_146 = arith.constant 0 : index
    %c0_147 = arith.constant 0 : index
    %334 = vector.load %arg18[%c0_146, %c0_147] : memref<32x128xf32, #tpu.memory_space<vmem>>, vector<32x128xf32>
    %335 = arith.truncf %333 : vector<1x32xf32> to vector<1x32xbf16>
    %336 = arith.truncf %334 : vector<32x128xf32> to vector<32x128xbf16>
    %cst_148 = arith.constant dense<0.000000e+00> : vector<1x128xf32>
    %337 = tpu.matmul %335, %336, %cst_148 {dimension_numbers = #tpu.dot_dimension_numbers<[1], [0], [0], [1], [0, 0, 1, 1], [], []>} : vector<1x32xbf16>, vector<32x128xbf16>, vector<1x128xf32> -> vector<1x128xf32>
    %c0_149 = arith.constant 0 : index
    %c0_150 = arith.constant 0 : index
    %338 = vector.load %arg19[%c0_149, %c0_150] : memref<1x128xf32, #tpu.memory_space<vmem>>, vector<1x128xf32>
    %339 = arith.addf %337, %338 : vector<1x128xf32>
    %cst_151 = arith.constant 0.000000e+00 : f32
    %340 = vector.broadcast %cst_151 : f32 to vector<1x128xf32>
    %341 = arith.maximumf %339, %340 : vector<1x128xf32>
    %c0_152 = arith.constant 0 : index
    %c0_153 = arith.constant 0 : index
    %342 = vector.load %arg20[%c0_152, %c0_153] : memref<128x1xf32, #tpu.memory_space<vmem>>, vector<128x1xf32>
    %343 = arith.truncf %341 : vector<1x128xf32> to vector<1x128xbf16>
    %344 = arith.truncf %342 : vector<128x1xf32> to vector<128x1xbf16>
    %cst_154 = arith.constant dense<0.000000e+00> : vector<1x1xf32>
    %345 = tpu.matmul %343, %344, %cst_154 {dimension_numbers = #tpu.dot_dimension_numbers<[1], [0], [0], [1], [0, 0, 1, 1], [], []>} : vector<1x128xbf16>, vector<128x1xbf16>, vector<1x1xf32> -> vector<1x1xf32>
    %c0_155 = arith.constant 0 : index
    %c0_156 = arith.constant 0 : index
    %346 = vector.load %arg21[%c0_155, %c0_156] : memref<1x1xf32, #tpu.memory_space<vmem>>, vector<1x1xf32>
    %347 = arith.addf %345, %346 : vector<1x1xf32>
    %348 = vector.shape_cast %347 : vector<1x1xf32> to vector<1x1xf32>
    %349 = vector.broadcast %348 : vector<1x1xf32> to vector<1x128xf32>
    %c0_157 = arith.constant 0 : index
    %c0_158 = arith.constant 0 : index
    %c0_159 = arith.constant 0 : index
    %350 = vector.load %arg22[%c0_157, %c0_158, %c0_159] : memref<1x1x128xf32, #tpu.memory_space<vmem>>, vector<1x1x128xf32>
    %351 = vector.shape_cast %350 : vector<1x1x128xf32> to vector<1x128xf32>
    %352 = vector.shape_cast %349 : vector<1x128xf32> to vector<1x1x128xf32>
    tpu.vector_store %arg22[%c0_157, %c0_158, %c0_159], %352 {strides = array<i32>} : memref<1x1x128xf32, #tpu.memory_space<vmem>>, vector<1x1x128xf32>,
    return
  }
  func.func @transform_0(%arg0: i32) -> (i32, i32, i32) {
    %c0_i32 = arith.constant 0 : i32
    %c0_i32_0 = arith.constant 0 : i32
    %c0_i32_1 = arith.constant 0 : i32
    return %arg0, %c0_i32, %c0_i32_0 : i32, i32, i32
  }
  func.func @transform_1(%arg0: i32) -> (i32, i32) {
    %c0_i32 = arith.constant 0 : i32
    %c0_i32_0 = arith.constant 0 : i32
    %c0_i32_1 = arith.constant 0 : i32
    return %c0_i32, %c0_i32_0 : i32, i32
  }
  func.func @transform_2(%arg0: i32) -> (i32, i32) {
    %c0_i32 = arith.constant 0 : i32
    %c0_i32_0 = arith.constant 0 : i32
    %c0_i32_1 = arith.constant 0 : i32
    return %c0_i32, %c0_i32_0 : i32, i32
  }
  func.func @transform_3(%arg0: i32) -> (i32, i32, i32) {
    %c0_i32 = arith.constant 0 : i32
    %c0_i32_0 = arith.constant 0 : i32
    %c0_i32_1 = arith.constant 0 : i32
    %c0_i32_2 = arith.constant 0 : i32
    return %c0_i32, %c0_i32_0, %c0_i32_1 : i32, i32, i32
  }
  func.func @transform_4(%arg0: i32) -> (i32, i32, i32) {
    %c0_i32 = arith.constant 0 : i32
    %c0_i32_0 = arith.constant 0 : i32
    %c0_i32_1 = arith.constant 0 : i32
    %c0_i32_2 = arith.constant 0 : i32
    return %c0_i32, %c0_i32_0, %c0_i32_1 : i32, i32, i32
  }
  func.func @transform_5(%arg0: i32) -> (i32, i32, i32) {
    %c0_i32 = arith.constant 0 : i32
    %c0_i32_0 = arith.constant 0 : i32
    %c0_i32_1 = arith.constant 0 : i32
    %c0_i32_2 = arith.constant 0 : i32
    return %c0_i32, %c0_i32_0, %c0_i32_1 : i32, i32, i32
  }
  func.func @transform_6(%arg0: i32) -> (i32, i32, i32) {
    %c0_i32 = arith.constant 0 : i32
    %c0_i32_0 = arith.constant 0 : i32
    %c0_i32_1 = arith.constant 0 : i32
    %c0_i32_2 = arith.constant 0 : i32
    return %c0_i32, %c0_i32_0, %c0_i32_1 : i32, i32, i32
  }
  func.func @transform_7(%arg0: i32) -> (i32, i32, i32) {
    %c0_i32 = arith.constant 0 : i32
    %c0_i32_0 = arith.constant 0 : i32
    %c0_i32_1 = arith.constant 0 : i32
    %c0_i32_2 = arith.constant 0 : i32
    return %c0_i32, %c0_i32_0, %c0_i32_1 : i32, i32, i32
  }
  func.func @transform_8(%arg0: i32) -> (i32, i32, i32) {
    %c0_i32 = arith.constant 0 : i32
    %c0_i32_0 = arith.constant 0 : i32
    %c0_i32_1 = arith.constant 0 : i32
    %c0_i32_2 = arith.constant 0 : i32
    return %c0_i32, %c0_i32_0, %c0_i32_1 : i32, i32, i32
  }
  func.func @transform_9(%arg0: i32) -> (i32, i32, i32) {
    %c0_i32 = arith.constant 0 : i32
    %c0_i32_0 = arith.constant 0 : i32
    %c0_i32_1 = arith.constant 0 : i32
    %c0_i32_2 = arith.constant 0 : i32
    return %c0_i32, %c0_i32_0, %c0_i32_1 : i32, i32, i32
  }
  func.func @transform_10(%arg0: i32) -> (i32, i32, i32) {
    %c0_i32 = arith.constant 0 : i32
    %c0_i32_0 = arith.constant 0 : i32
    %c0_i32_1 = arith.constant 0 : i32
    %c0_i32_2 = arith.constant 0 : i32
    return %c0_i32, %c0_i32_0, %c0_i32_1 : i32, i32, i32
  }
  func.func @transform_11(%arg0: i32) -> (i32, i32, i32) {
    %c0_i32 = arith.constant 0 : i32
    %c0_i32_0 = arith.constant 0 : i32
    %c0_i32_1 = arith.constant 0 : i32
    %c0_i32_2 = arith.constant 0 : i32
    return %c0_i32, %c0_i32_0, %c0_i32_1 : i32, i32, i32
  }
  func.func @transform_12(%arg0: i32) -> (i32, i32, i32) {
    %c0_i32 = arith.constant 0 : i32
    %c0_i32_0 = arith.constant 0 : i32
    %c0_i32_1 = arith.constant 0 : i32
    %c0_i32_2 = arith.constant 0 : i32
    return %c0_i32, %c0_i32_0, %c0_i32_1 : i32, i32, i32
  }
  func.func @transform_13(%arg0: i32) -> (i32, i32, i32) {
    %c0_i32 = arith.constant 0 : i32
    %c0_i32_0 = arith.constant 0 : i32
    %c0_i32_1 = arith.constant 0 : i32
    %c0_i32_2 = arith.constant 0 : i32
    return %c0_i32, %c0_i32_0, %c0_i32_1 : i32, i32, i32
  }
  func.func @transform_14(%arg0: i32) -> (i32, i32, i32) {
    %c0_i32 = arith.constant 0 : i32
    %c0_i32_0 = arith.constant 0 : i32
    %c0_i32_1 = arith.constant 0 : i32
    %c0_i32_2 = arith.constant 0 : i32
    return %c0_i32, %c0_i32_0, %c0_i32_1 : i32, i32, i32
  }
  func.func @transform_15(%arg0: i32) -> (i32, i32) {
    %c0_i32 = arith.constant 0 : i32
    %c0_i32_0 = arith.constant 0 : i32
    %c0_i32_1 = arith.constant 0 : i32
    return %c0_i32, %c0_i32_0 : i32, i32
  }
  func.func @transform_16(%arg0: i32) -> (i32, i32) {
    %c0_i32 = arith.constant 0 : i32
    %c0_i32_0 = arith.constant 0 : i32
    %c0_i32_1 = arith.constant 0 : i32
    return %c0_i32, %c0_i32_0 : i32, i32
  }
  func.func @transform_17(%arg0: i32) -> (i32, i32) {
    %c0_i32 = arith.constant 0 : i32
    %c0_i32_0 = arith.constant 0 : i32
    %c0_i32_1 = arith.constant 0 : i32
    return %c0_i32, %c0_i32_0 : i32, i32
  }
  func.func @transform_18(%arg0: i32) -> (i32, i32) {
    %c0_i32 = arith.constant 0 : i32
    %c0_i32_0 = arith.constant 0 : i32
    %c0_i32_1 = arith.constant 0 : i32
    return %c0_i32, %c0_i32_0 : i32, i32
  }
  func.func @transform_19(%arg0: i32) -> (i32, i32) {
    %c0_i32 = arith.constant 0 : i32
    %c0_i32_0 = arith.constant 0 : i32
    %c0_i32_1 = arith.constant 0 : i32
    return %c0_i32, %c0_i32_0 : i32, i32
  }
  func.func @transform_20(%arg0: i32) -> (i32, i32) {
    %c0_i32 = arith.constant 0 : i32
    %c0_i32_0 = arith.constant 0 : i32
    %c0_i32_1 = arith.constant 0 : i32
    return %c0_i32, %c0_i32_0 : i32, i32
  }
  func.func @transform_21(%arg0: i32) -> (i32, i32, i32) {
    %c0_i32 = arith.constant 0 : i32
    %c0_i32_0 = arith.constant 0 : i32
    %c0_i32_1 = arith.constant 0 : i32
    return %arg0, %c0_i32, %c0_i32_0 : i32, i32, i32
  }
}

</mosaic_0001>

<bundles_post_ra>
// kernel: custom_vit_forward.1
= control target key start
LH: loop header
LB: loop body
LE: loop exit
PB: predicated region body
PF: predicated region fallthrough
CT: control target
= control target key end

     0   :  { %s2774_s26 = smov 0   ;;  %s3563_s0 = inlined_call_operand.vmem [shape: f32[2,8,768], index: 0, kind: input, shape index: {}]   ;;  %s3564_s1 = inlined_call_operand.vmem [shape: f32[768,32], index: 1, kind: input, shape index: {}]   ;;  %s3565_s2 = inlined_call_operand.vmem [shape: f32[8,32], index: 2, kind: input, shape index: {}]   ;;  %s3566_s3 = inlined_call_operand.vmem [shape: f32[2,1,32], index: 3, kind: input, shape index: {}]   ;;  %s3567_s4 = inlined_call_operand.vmem [shape: f32[2,1,32], index: 4, kind: input, shape index: {}]   ;;  %s3568_s5 = inlined_call_operand.vmem [shape: f32[2,32,96], index: 5, kind: input, shape index: {}]   ;;  %s3569_s6 = inlined_call_operand.vmem [shape: f32[2,1,96], index: 6, kind: input, shape index: {}]   ;;  %s3570_s7 = inlined_call_operand.vmem [shape: f32[2,32,32], index: 7, kind: input, shape index: {}]   ;;  %s3571_s8 = inlined_call_operand.vmem [shape: f32[2,1,32], index: 8, kind: input, shape index: {}]   ;;  %s3572_s9 = inlined_call_operand.vmem [shape: f32[2,1,32], index: 9, kind: input, shape index: {}]   ;;  %s3573_s10 = inlined_call_operand.vmem [shape: f32[2,1,32], index: 10, kind: input, shape index: {}]   ;;  %s3574_s11 = inlined_call_operand.vmem [shape: f32[2,32,128], index: 11, kind: input, shape index: {}]   ;;  %s3575_s12 = inlined_call_operand.vmem [shape: f32[2,1,128], index: 12, kind: input, shape index: {}]   ;;  %s3576_s13 = inlined_call_operand.vmem [shape: f32[2,128,32], index: 13, kind: input, shape index: {}]   ;;  %s3577_s14 = inlined_call_operand.vmem [shape: f32[2,1,32], index: 14, kind: input, shape index: {}]   ;;  %s3578_s15 = inlined_call_operand.vmem [shape: f32[1,32], index: 15, kind: input, shape index: {}]   ;;  %s3579_s16 = inlined_call_operand.vmem [shape: f32[1,32], index: 16, kind: input, shape index: {}]   ;;  %s3580_s17 = inlined_call_operand.vmem [shape: f32[32,128], index: 17, kind: input, shape index: {}]   ;;  %s3581_s18 = inlined_call_operand.vmem [shape: f32[1,128], index: 18, kind: input, shape index: {}]   ;;  %s3582_s19 = inlined_call_operand.vmem [shape: f32[128,1], index: 19, kind: input, shape index: {}]   ;;  %s3583_s20 = inlined_call_operand.<no memory space> [shape: f32[1,1], index: 20, kind: input, shape index: {}]   ;;  %s3584_s21 = inlined_call_operand.vmem [shape: f32[2,1,128], index: 21, kind: output, shape index: {}]  }
   0x1   :  { %3594 = sst [smem:[#allocation3_spill]] %s3563_s0  ;;  %v26_v0 = vstv %s3583_s20 }
   0x2   :  { %3595 = sst [smem:[#allocation4_spill]] %s3564_s1  ;;  %27 = vst [vmem:[#allocation2] sm:$0x1] %v26_v0 }
   0x3   :  { %3596 = sst [smem:[#allocation5_spill]] %s3565_s2 }
   0x4   :  { %3597 = sst [smem:[#allocation6_spill]] %s3566_s3 }
   0x5   :  { %3598 = sst [smem:[#allocation7_spill]] %s3567_s4 }
   0x6   :  { %3599 = sst [smem:[#allocation8_spill]] %s3568_s5 }
   0x7 LB: > { %s2226_s27 = sadd.s32 4294967295, %s2650_s26   ;;  %p2230_p0 = scmp.ge.s32.totalorder %s2650_s26, 1  ;;  %s2650_s26 = sphi %s2774_s26, %s33_s26  }
   0x8   : > { %p589_p1 = scmp.lt.s32.totalorder %s2650_s26, 3 }
   0xa   : > { %p590_p2 = pnand %p2230_p0, %p589_p1 }
   0xb   : > { %s3600_s29 = sld [smem:[#allocation4_spill]] (!%p590_p2)  ;;  %p2838_p3 = scmp.lt.s32.totalorder (!%p590_p2), %s2226_s27, 1 }
   0xc   : > { %593 = sbr.rel (%p590_p2) target bundleno = 6912 (0x1b00), region = 104  ;;  %s3602_s1 = sld [smem:[#allocation3_spill]] (!%p590_p2) }
   0xd   : > { %s3603_s4 = sld [smem:[#allocation5_spill]] (!%p590_p2)  ;;  %s3593_s22 = smov (!%p590_p2), 64  }
   0xe   : > { %s3604_s24 = sld [smem:[#allocation8_spill]] (!%p590_p2)  ;;  %s2655_s23 = smov (!%p590_p2), 96  }
   0xf   : > { %s3605_s20 = sld [smem:[#allocation6_spill]] (!%p590_p2)  ;;  %s3591_s25 = smov (!%p590_p2), 112  }
  0x10   : > { %s3606_s30 = sld [smem:[#allocation7_spill]] (!%p590_p2)  ;;  %s3589_s3 = smov (!%p590_p2), 48  }
  0x11   : > { %v692_v1 = vld [vmem:[%s3600_s29 + $0xf0] sm:$0xff]  ;;  %v693_v2 = vld [vmem:[%s3600_s29 + $0xf8] sm:$0xff]  ;;  %v690_v12 = vld [vmem:[%s3600_s29 + $0xe0] sm:$0xff]  ;;  %s3613_s27 = smov (!%p2838_p3, %s2226_s27), 1  ;;  %vm938_vm0 = vcmask 261120   ;;  %vm2653_vm1 = vmmov 0  }
  0x12   : > { %v676_v3 = vld [vmem:[%s3600_s29 + $0x70] sm:$0xff]  ;;  %v779_v4 = vpack.c.bf16 %v693_v2, %v692_v1  ;;  %v677_v5 = vld [vmem:[%s3600_s29 + $0x78] sm:$0xff]  ;;  %v691_v14 = vld [vmem:[%s3600_s29 + $0xe8] sm:$0xff]  ;;  %s2595_s0 = smul.u32 48, %s3613_s27  ;;  %vm1028_vm2 = vcmask 130048   ;;  %vm1095_vm3 = vcmask 1043456  }
  0x13   : > { %v724_v6 = vld [vmem:[%s3600_s29 + $0x1f0] sm:$0xff]  ;;  %v725_v7 = vld [vmem:[%s3600_s29 + $0x1f8] sm:$0xff]  ;;  %v771_v8 = vpack.c.bf16 %v677_v5, %v676_v3  ;;  %v674_v15 = vld [vmem:[%s3600_s29 + $0x60] sm:$0xff]  ;;  %v778_v17 = vpack.c.bf16 %v691_v14, %v690_v12  ;;  %vm1077_vm5 = vcmask 64512   ;;  %s3592_s28 = smov 16   ;;  %vm2039_vm6 = vcmask 253952  }
  0x14   : > { %v795_v9 = vpack.c.bf16 %v725_v7, %v724_v6  ;;  %v708_v10 = vld [vmem:[%s3600_s29 + $0x170] sm:$0xff]  ;;  %v709_v11 = vld [vmem:[%s3600_s29 + $0x178] sm:$0xff]  ;;  %2301 = vmatprep.subr.bf16.mxu0 %v779_v4  ;;  %v675_v16 = vld [vmem:[%s3600_s29 + $0x68] sm:$0xff]  ;;  %s2939_s2 = scalar_lea.vmem %s3602_s1, %s2595_s0  ;;  %s3590_s1 = smov 80  }
  0x15   : > { %v787_v13 = vpack.c.bf16 %v709_v11, %v708_v10  ;;  %2302 = vmatpush3.bf16.msra.mxu0 %v771_v8  ;;  %v770_v18 = vpack.c.bf16 %v675_v16, %v674_v15  ;;  %v722_v19 = vld [vmem:[%s3600_s29 + $0x1e0] sm:$0xff]  ;;  %v723_v20 = vld [vmem:[%s3600_s29 + $0x1e8] sm:$0xff]  ;;  %v688_v24 = vld [vmem:[%s3600_s29 + $0xd0] sm:$0xff] }
  0x16   : > { %2323 = vmatprep.subr.bf16.mxu1 %v795_v9  ;;  %v706_v21 = vld [vmem:[%s3600_s29 + $0x160] sm:$0xff]  ;;  %v794_v22 = vpack.c.bf16 %v723_v20, %v722_v19  ;;  %v707_v23 = vld [vmem:[%s3600_s29 + $0x168] sm:$0xff]  ;;  %v689_v25 = vld [vmem:[%s3600_s29 + $0xd8] sm:$0xff]  ;;  %2303 = vmatprep.subr.bf16.mxu0 %v778_v17 }
  0x17   : > { %2324 = vmatpush3.bf16.msra.mxu1 %v787_v13  ;;  %v786_v26 = vpack.c.bf16 %v707_v23, %v706_v21  ;;  %v777_v27 = vpack.c.bf16 %v689_v25, %v688_v24  ;;  %v672_v28 = vld [vmem:[%s3600_s29 + $0x50] sm:$0xff]  ;;  %v673_v29 = vld [vmem:[%s3600_s29 + $0x58] sm:$0xff]  ;;  %v686_v36 = vld [vmem:[%s3600_s29 + $0xc0] sm:$0xff] }
  0x18   : > { %v720_v30 = vld [vmem:[%s3600_s29 + $0x1d0] sm:$0xff]  ;;  %2325 = vmatprep.subr.bf16.mxu1 %v794_v22  ;;  %v721_v31 = vld [vmem:[%s3600_s29 + $0x1d8] sm:$0xff]  ;;  %v769_v34 = vpack.c.bf16 %v673_v29, %v672_v28  ;;  %v687_v37 = vld [vmem:[%s3600_s29 + $0xc8] sm:$0xff] }
  0x19   : > { %v704_v32 = vld [vmem:[%s3600_s29 + $0x150] sm:$0xff]  ;;  %v705_v33 = vld [vmem:[%s3600_s29 + $0x158] sm:$0xff]  ;;  %2304 = vmatpush3.bf16.msra.mxu0 %v770_v18  ;;  %v793_v35 = vpack.c.bf16 %v721_v31, %v720_v30  ;;  %v670_v38 = vld [vmem:[%s3600_s29 + $0x40] sm:$0xff]  ;;  %v776_v40 = vpack.c.bf16 %v687_v37, %v686_v36 }
  0x1a   : > { %2305 = vmatprep.subr.bf16.mxu0 %v777_v27  ;;  %v785_v39 = vpack.c.bf16 %v705_v33, %v704_v32  ;;  %v671_v41 = vld [vmem:[%s3600_s29 + $0x48] sm:$0xff]  ;;  %v718_v42 = vld [vmem:[%s3600_s29 + $0x1c0] sm:$0xff]  ;;  %v684_v47 = vld [vmem:[%s3600_s29 + $0xb0] sm:$0xff] }
  0x1b   : > { %2326 = vmatpush3.bf16.msra.mxu1 %v786_v26  ;;  %v719_v43 = vld [vmem:[%s3600_s29 + $0x1c8] sm:$0xff]  ;;  %v702_v45 = vld [vmem:[%s3600_s29 + $0x140] sm:$0xff]  ;;  %v685_v48 = vld [vmem:[%s3600_s29 + $0xb8] sm:$0xff]  ;;  %v768_v49 = vpack.c.bf16 %v671_v41, %v670_v38 }
  0x1c   : > { %2327 = vmatprep.subr.bf16.mxu1 %v793_v35  ;;  %v792_v44 = vpack.c.bf16 %v719_v43, %v718_v42  ;;  %v703_v46 = vld [vmem:[%s3600_s29 + $0x148] sm:$0xff]  ;;  %v716_v50 = vld [vmem:[%s3600_s29 + $0x1b0] sm:$0xff]  ;;  %v717_v51 = vld [vmem:[%s3600_s29 + $0x1b8] sm:$0xff]  ;;  %v775_v53 = vpack.c.bf16 %v685_v48, %v684_v47 }
  0x1d   : > { %2306 = vmatpush3.bf16.msra.mxu0 %v769_v34  ;;  %v784_v52 = vpack.c.bf16 %v703_v46, %v702_v45  ;;  %v668_v54 = vld [vmem:[%s3600_s29 + $0x30] sm:$0xff]  ;;  %v669_v55 = vld [vmem:[%s3600_s29 + $0x38] sm:$0xff]  ;;  %v791_v57 = vpack.c.bf16 %v717_v51, %v716_v50  ;;  %v682_v59 = vld [vmem:[%s3600_s29 + $0xa0] sm:$0xff] }
  0x1e   : > { %2307 = vmatprep.subr.bf16.mxu0 %v776_v40  ;;  %v700_v56 = vld [vmem:[%s3600_s29 + $0x130] sm:$0xff]  ;;  %v701_v58 = vld [vmem:[%s3600_s29 + $0x138] sm:$0xff]  ;;  %v683_v60 = vld [vmem:[%s3600_s29 + $0xa8] sm:$0xff]  ;;  %v767_v63 = vpack.c.bf16 %v669_v55, %v668_v54 }
  0x1f   : > { %2328 = vmatpush3.bf16.msra.mxu1 %v785_v39  ;;  %v714_v61 = vld [vmem:[%s3600_s29 + $0x1a0] sm:$0xff]  ;;  %v715_v62 = vld [vmem:[%s3600_s29 + $0x1a8] sm:$0xff]  ;;  %v783_v0 = vpack.c.bf16 %v701_v58, %v700_v56  ;;  %v774_v1 = vpack.c.bf16 %v683_v60, %v682_v59  ;;  %v680_v7 = vld [vmem:[%s3600_s29 + $0x90] sm:$0xff] }
  0x20   : > { %2329 = vmatprep.subr.bf16.mxu1 %v792_v44  ;;  %v666_v2 = vld [vmem:[%s3600_s29 + $0x20] sm:$0xff]  ;;  %v667_v3 = vld [vmem:[%s3600_s29 + $0x28] sm:$0xff]  ;;  %v790_v5 = vpack.c.bf16 %v715_v62, %v714_v61  ;;  %v681_v8 = vld [vmem:[%s3600_s29 + $0x98] sm:$0xff] }
  0x21   : > { %2308 = vmatpush3.bf16.msra.mxu0 %v768_v49  ;;  %v698_v4 = vld [vmem:[%s3600_s29 + $0x120] sm:$0xff]  ;;  %v699_v6 = vld [vmem:[%s3600_s29 + $0x128] sm:$0xff]  ;;  %v712_v9 = vld [vmem:[%s3600_s29 + $0x190] sm:$0xff]  ;;  %v766_v11 = vpack.c.bf16 %v667_v3, %v666_v2  ;;  %v773_v15 = vpack.c.bf16 %v681_v8, %v680_v7 }
  0x22   : > { %2309 = vmatprep.subr.bf16.mxu0 %v775_v53  ;;  %v713_v10 = vld [vmem:[%s3600_s29 + $0x198] sm:$0xff]  ;;  %v664_v12 = vld [vmem:[%s3600_s29 + $0x10] sm:$0xff]  ;;  %v657_v13 = vld [vmem:[%s2939_s2 + $0x8] sm:$0xff]  ;;  %v782_v14 = vpack.c.bf16 %v699_v6, %v698_v4 }
  0x23   : > { %2330 = vmatpush3.bf16.msra.mxu1 %v784_v52  ;;  %v665_v16 = vld [vmem:[%s3600_s29 + $0x18] sm:$0xff]  ;;  %v696_v17 = vld [vmem:[%s3600_s29 + $0x110] sm:$0xff]  ;;  %v759_v19 = vpack.c.bf16 %v657_v13, %v657_v13  ;;  %v789_v20 = vpack.c.bf16 %v713_v10, %v712_v9  ;;  %v678_v21 = vld [vmem:[%s3600_s29 + $0x80] sm:$0xff] }
  0x24   : > { %2331 = vmatprep.subr.bf16.mxu1 %v791_v57  ;;  %v697_v18 = vld [vmem:[%s3600_s29 + $0x118] sm:$0xff]  ;;  %v679_v22 = vld [vmem:[%s3600_s29 + $0x88] sm:$0xff]  ;;  %v710_v24 = vld [vmem:[%s3600_s29 + $0x180] sm:$0xff]  ;;  %v765_v27 = vpack.c.bf16 %v665_v16, %v664_v12 }
  0x25   : > { %2310 = vmatpush3.bf16.msra.mxu0 %v767_v63  ;;  %v659_v23 = vld [vmem:[%s2939_s2 + $0x18] sm:$0xff]  ;;  %v711_v25 = vld [vmem:[%s3600_s29 + $0x188] sm:$0xff]  ;;  %845 = vmatprep.mubr.bf16.mxu0 %v759_v19  ;;  %v781_v28 = vpack.c.bf16 %v697_v18, %v696_v17  ;;  %v772_v29 = vpack.c.bf16 %v679_v22, %v678_v21  ;;  %v662_v30 = vld [vmem:[%s3600_s29] sm:$0xff] }
  0x26   : > { %2311 = vmatprep.subr.bf16.mxu0 %v774_v1  ;;  %v761_v26 = vpack.c.bf16 %v659_v23, %v659_v23  ;;  %v663_v31 = vld [vmem:[%s3600_s29 + $0x8] sm:$0xff]  ;;  %v694_v32 = vld [vmem:[%s3600_s29 + $0x100] sm:$0xff]  ;;  %v788_v33 = vpack.c.bf16 %v711_v25, %v710_v24  ;;  %v756_v35 = vld [vmem:[%s3600_s29 + $0x2f0] sm:$0xff] }
  0x27   : > { %2332 = vmatpush3.bf16.msra.mxu1 %v783_v0  ;;  %v695_v34 = vld [vmem:[%s3600_s29 + $0x108] sm:$0xff]  ;;  %v757_v36 = vld [vmem:[%s3600_s29 + $0x2f8] sm:$0xff]  ;;  %v764_v37 = vpack.c.bf16 %v663_v31, %v662_v30  ;;  %v656_v38 = vld [vmem:[%s2939_s2] sm:$0xff] }
  0x28   : > { %2333 = vmatprep.subr.bf16.mxu1 %v790_v5  ;;  %885 = vmatprep.mubr.bf16.mxu1 %v761_v26  ;;  %v780_v39 = vpack.c.bf16 %v695_v34, %v694_v32  ;;  %v811_v40 = vpack.c.bf16 %v757_v36, %v756_v35  ;;  %v740_v41 = vld [vmem:[%s3600_s29 + $0x270] sm:$0xff]  ;;  %v741_v42 = vld [vmem:[%s3600_s29 + $0x278] sm:$0xff]  ;;  %v754_v44 = vld [vmem:[%s3600_s29 + $0x2e0] sm:$0xff]  ;;  %v758_v46 = vpack.c.bf16 %v656_v38, %v656_v38 }
  0x29   : > { %2312 = vmatpush3.bf16.msra.mxu0 %v766_v11  ;;  %v658_v43 = vld [vmem:[%s2939_s2 + $0x10] sm:$0xff]  ;;  %v755_v45 = vld [vmem:[%s3600_s29 + $0x2e8] sm:$0xff]  ;;  %v803_v47 = vpack.c.bf16 %v741_v42, %v740_v41  ;;  %v738_v50 = vld [vmem:[%s3600_s29 + $0x260] sm:$0xff] }
  0x2a   : > { %2313 = vmatprep.subr.bf16.mxu0 %v773_v15  ;;  %v760_v48 = vpack.c.bf16 %v658_v43, %v658_v43  ;;  %v810_v49 = vpack.c.bf16 %v755_v45, %v754_v44  ;;  %v739_v51 = vld [vmem:[%s3600_s29 + $0x268] sm:$0xff]  ;;  %v752_v53 = vld [vmem:[%s3600_s29 + $0x2d0] sm:$0xff]  ;;  %v753_v54 = vld [vmem:[%s3600_s29 + $0x2d8] sm:$0xff] }
  0x2b   : > { %2334 = vmatpush3.bf16.msra.mxu1 %v782_v14  ;;  %v661_v52 = vld [vmem:[%s2939_s2 + $0x28] sm:$0xff]  ;;  %v802_v56 = vpack.c.bf16 %v739_v51, %v738_v50  ;;  %v809_v57 = vpack.c.bf16 %v753_v54, %v752_v53  ;;  %v736_v58 = vld [vmem:[%s3600_s29 + $0x250] sm:$0xff]  ;;  %v737_v59 = vld [vmem:[%s3600_s29 + $0x258] sm:$0xff] }
  0x2c   : > { %2335 = vmatprep.subr.bf16.mxu1 %v789_v20  ;;  %v763_v55 = vpack.c.bf16 %v661_v52, %v661_v52  ;;  %v750_v60 = vld [vmem:[%s3600_s29 + $0x2c0] sm:$0xff]  ;;  %v751_v61 = vld [vmem:[%s3600_s29 + $0x2c8] sm:$0xff]  ;;  %v801_v62 = vpack.c.bf16 %v737_v59, %v736_v58  ;;  %v748_v2 = vld [vmem:[%s3600_s29 + $0x2b0] sm:$0xff] }
  0x2d   : > { %2314 = vmatpush3.bf16.msra.mxu0 %v765_v27  ;;  %v808_v63 = vpack.c.bf16 %v751_v61, %v750_v60  ;;  %v734_v0 = vld [vmem:[%s3600_s29 + $0x240] sm:$0xff]  ;;  %v735_v1 = vld [vmem:[%s3600_s29 + $0x248] sm:$0xff]  ;;  %v749_v3 = vld [vmem:[%s3600_s29 + $0x2b8] sm:$0xff] }
  0x2e   : > { %2315 = vmatprep.subr.bf16.mxu0 %v772_v29  ;;  %v800_v4 = vpack.c.bf16 %v735_v1, %v734_v0  ;;  %v807_v5 = vpack.c.bf16 %v749_v3, %v748_v2  ;;  %v732_v6 = vld [vmem:[%s3600_s29 + $0x230] sm:$0xff]  ;;  %v733_v7 = vld [vmem:[%s3600_s29 + $0x238] sm:$0xff]  ;;  %v746_v8 = vld [vmem:[%s3600_s29 + $0x2a0] sm:$0xff] }
  0x2f   : > { %2336 = vmatpush3.bf16.msra.mxu1 %v781_v28  ;;  %v747_v9 = vld [vmem:[%s3600_s29 + $0x2a8] sm:$0xff]  ;;  %v799_v10 = vpack.c.bf16 %v733_v7, %v732_v6  ;;  %v730_v12 = vld [vmem:[%s3600_s29 + $0x220] sm:$0xff]  ;;  %v744_v14 = vld [vmem:[%s3600_s29 + $0x290] sm:$0xff] }
  0x30   : > { %2337 = vmatprep.subr.bf16.mxu1 %v788_v33  ;;  %v806_v11 = vpack.c.bf16 %v747_v9, %v746_v8  ;;  %v731_v13 = vld [vmem:[%s3600_s29 + $0x228] sm:$0xff]  ;;  %v745_v15 = vld [vmem:[%s3600_s29 + $0x298] sm:$0xff]  ;;  %v728_v18 = vld [vmem:[%s3600_s29 + $0x210] sm:$0xff] }
  0x31   : > { %2316 = vmatpush3.bf16.msra.mxu0 %v764_v37  ;;  %v798_v16 = vpack.c.bf16 %v731_v13, %v730_v12  ;;  %v805_v17 = vpack.c.bf16 %v745_v15, %v744_v14  ;;  %v729_v19 = vld [vmem:[%s3600_s29 + $0x218] sm:$0xff]  ;;  %v742_v20 = vld [vmem:[%s3600_s29 + $0x280] sm:$0xff]  ;;  %v743_v21 = vld [vmem:[%s3600_s29 + $0x288] sm:$0xff] }
  0x32   : > { %2345 = vmatprep.subr.bf16.mxu0 %v811_v40  ;;  %v797_v22 = vpack.c.bf16 %v729_v19, %v728_v18  ;;  %v804_v23 = vpack.c.bf16 %v743_v21, %v742_v20  ;;  %v726_v24 = vld [vmem:[%s3600_s29 + $0x200] sm:$0xff]  ;;  %v727_v25 = vld [vmem:[%s3600_s29 + $0x208] sm:$0xff]  ;;  %v969_v54 = vld [vmem:[%s3604_s24 + $0x10] sm:$0xff]  ;;  %v933_v18 = vlaneseq }
  0x33   : > { %2338 = vmatpush3.bf16.msra.mxu1 %v780_v39  ;;  %v796_v26 = vpack.c.bf16 %v727_v25, %v726_v24  ;;  %v660_v27 = vld [vmem:[%s2939_s2 + $0x20] sm:$0xff]  ;;  %v968_v59 = vld [vmem:[%s3604_s24 + $0x8] sm:$0xff]  ;;  %s3607_s2 = smov 64  }
  0x34   : > { %846 = vmatmul.mubr.bf16.vlgmr.msra.gmra.mxu0 %v758_v46  ;;  %v762_v28 = vpack.c.bf16 %v660_v27, %v660_v27  ;;  %v812_v38 = vld [vmem:[%s3603_s4] sm:$0xff]  ;;  %v3149_v19 = vand.u32 127, %v933_v18 }
  0x35   : > { %2346 = vmatpush3.bf16.msra.mxu0 %v803_v47  ;;  %925 = vmatprep.mubr.bf16.mxu0 %v763_v55  ;;  %v970_v55 = vld [vmem:[%s3604_s24 + $0x18] sm:$0xff]  ;;  %v967_v58 = vld [vmem:[%s3604_s24] sm:$0xff] }
  0x36   : > { %886 = vmatmul.mubr.bf16.vlgmr.msra.gmra.mxu1 %v760_v48  ;;  %2347 = vmatprep.subr.bf16.mxu0 %v810_v49  ;;  %v972_v60 = vpack.c.bf16 %v968_v59, %v967_v58  ;;  %v2232_v1 = vld [vmem:[%s3605_s20] ss:$0 sm:$0xff]  ;;  %vm935_vm4 = vcmp.lt.s32.totalorder %v3149_v19, 5 }
  0x37   : > { %v2233_v3 = vld [vmem:[%s3606_s30] ss:$0 sm:$0xff] }
  0x38   : > { %v2234_v7 = vld [vmem:[%s3569_s6] ss:$0 sm:$0xff] }
  0x39   : > { %2348 = vmatpush3.bf16.msra.mxu0 %v802_v56  ;;  %v973_v56 = vpack.c.bf16 %v970_v55, %v969_v54 }
  0x3a   : > { %2349 = vmatprep.subr.bf16.mxu0 %v809_v57  ;;  %v2652_v57 = vmov 0.0  }
  0x3b   : > { %2431 = vmatprep.subr.bf16.mxu1 %v2652_v57  ;;  %2435 = vmatprep.mubr.msk.bf16.mxu1 %vm2653_vm1, %v2652_v57 }
  0x3c   : > { %2432 = vmatpush3.bf16.msra.mxu1 %v973_v56 }
  0x3d   : > { %2350 = vmatpush3.bf16.msra.mxu0 %v801_v62  ;;  %2433 = vmatprep.subr.bf16.mxu1 %v2652_v57 }
  0x3e   : > { %2351 = vmatprep.subr.bf16.mxu0 %v808_v63 }
  0x40   : > { %2434 = vmatpush3.bf16.msra.mxu1 %v972_v60 }
  0x41   : > { %2352 = vmatpush3.bf16.msra.mxu0 %v800_v4  ;;  %2439 = vmatprep.subr.bf16.mxu1 %v2652_v57 }
  0x42   : > { %2353 = vmatprep.subr.bf16.mxu0 %v807_v5 }
  0x45   : > { %2354 = vmatpush3.bf16.msra.mxu0 %v799_v10 }
  0x46   : > { %2355 = vmatprep.subr.bf16.mxu0 %v806_v11 }
  0x49   : > { %2356 = vmatpush3.bf16.msra.mxu0 %v798_v16 }
  0x4a   : > { %2357 = vmatprep.subr.bf16.mxu0 %v805_v17 }
  0x4d   : > { %2358 = vmatpush3.bf16.msra.mxu0 %v797_v22 }
  0x4e   : > { %2359 = vmatprep.subr.bf16.mxu0 %v804_v23 }
  0x51   : > { %2360 = vmatpush3.bf16.msra.mxu0 %v796_v26 }
  0x52   : > { %2457 = vmatprep.subr.bf16.mxu0 %v2652_v57 }
  0x54   : > { %926 = vmatmul.mubr.bf16.vlgmr.msra.gmra.mxu0 %v762_v28 }
  0x55   : > { %2459 = vmatprep.mubr.msk.bf16.mxu0 %vm2653_vm1, %v2652_v57 }
  0xf4   : > { %v2317_v29 = vpop.f32.mrf.mxu0 }
  0xf6   : > { %v2339_v30 = vpop.f32.mrf.mxu1  ;;  %v2318_v31 = vpop.f32.mrf.mxu0 }
  0xf7   : > { %v2319_v37 = vadd.f32 %v2318_v31, %v2317_v29 }
  0xf8   : > { %v2340_v32 = vpop.f32.mrf.mxu1  ;;  %v2320_v33 = vpop.f32.mrf.mxu0 }
  0xf9   : > { %v848_v39 = vadd.f32 %v2319_v37, %v812_v38  ;;  %v2341_v40 = vadd.f32 %v2340_v32, %v2339_v30 }
  0xfa   : > { %v2342_v34 = vpop.f32.mrf.mxu1  ;;  %v2321_v35 = vpop.f32.mrf.mxu0 }
  0xfb   : > { %v888_v43 = vadd.f32 %v2341_v40, %v848_v39 }
  0xfc   : > { %v2343_v36 = vpop.f32.mrf.mxu1 }
 0x114   : > { %v2361_v41 = vpop.f32.mrf.mxu0 }
 0x116   : > { %v2362_v42 = vpop.f32.mrf.mxu0 }
 0x117   : > { %v2363_v44 = vadd.f32 %v2362_v42, %v2361_v41 }
 0x118   : > { %v2364_v45 = vpop.f32.mrf.mxu0 }
 0x119   : > { %v3097_v46 = vadd.f32 %v2363_v44, %v888_v43 }
 0x11a   : > { %v2365_v47 = vpop.f32.mrf.mxu0 }
 0x11b   : > { %v939_v48 = vsel %vm938_vm0, %v3097_v46, 0.0 }
 0x11c   : > { %940 = vadd.xlane.f32.xlu0 %v939_v48 }
 0x1a5   : > { %v941_v49 = vpop.xlane.xlu0 %940 }
 0x1a6   : > { %v943_v50 = vmul.f32 0.03125, %v941_v49 }
 0x1a8   : > { %v944_v51 = vsub.f32 %v3097_v46, %v943_v50 }
 0x1aa   : > { %v945_v52 = vmul.f32 %v944_v51, %v944_v51 }
 0x1ac   : > { %v946_v53 = vsel %vm938_vm0, %v945_v52, 0.0 }
 0x1ad   : > { %947 = vadd.xlane.f32.xlu0 %v946_v53 }
 0x236   : > { %v948_v61 = vpop.xlane.xlu0 %947 }
 0x237   : > { %v949_v62 = vmul.f32 0.03125, %v948_v61 }
 0x239   : > { %v950_v63 = vadd.f32 1e-12, %v949_v62 }
 0x23b   : > { %2614 = vrsqrt.f32 %v950_v63  ;;  %v1258_v63 = vld [vmem:[%s3570_s7 + $0x10] sm:$0xff] }
 0x248   : > { %v2615_v0 = vpop.eup %2614 }
 0x249   : > { %v952_v2 = vmul.f32 %v2615_v0, %v944_v51  ;;  %v1259_v0 = vld [vmem:[%s3570_s7 + $0x18] sm:$0xff] }
 0x24b   : > { %v959_v4 = vmul.f32 %v2232_v1, %v952_v2  ;;  %v1262_v1 = vpack.c.bf16 %v1259_v0, %v1258_v63  ;;  %v1256_v2 = vld [vmem:[%s3570_s7] sm:$0xff] }
 0x24c   : > { %v1410_v0 = vld [vmem:[%s3576_s13] sm:$0xff] }
 0x24d   : > { %v966_v5 = vadd.f32 %v2233_v3, %v959_v4  ;;  %v1257_v3 = vld [vmem:[%s3570_s7 + $0x8] sm:$0xff] }
 0x24e   : > { %v1261_v4 = vpack.c.bf16 %v1257_v3, %v1256_v2  ;;  %v2244_v3 = vld [vmem:[%s3575_s12] ss:$0 sm:$0xff] }
 0x24f   : > { %v971_v6 = vpack.c.bf16 %v966_v5, %v966_v5 }
 0x251   : > { %2436 = vmatmul.mubr.msk.bf16.vlgmr.msra.gmra.mxu1 %vm938_vm0, %v971_v6 }
 0x252   : > { %2441 = vmatprep.mubr.msk.bf16.mxu1 %vm2653_vm1, %v2652_v57 }
 0x311   : > { %v1018_v8 = vpop.f32.mrf.mxu1 }
 0x312   : > { %v1019_v9 = vadd.f32 %v2234_v7, %v1018_v8 }
 0x313   : > { %v2437_v10 = vpop.f32.mrf.mxu1 }
 0x314   : > { %v3135_v11 = vpack.c.bf16 %v1019_v9, %v1019_v9 }
 0x315   : > { %v1021_v12 = vpop.f32.mrf.mxu1 }
 0x316   : > { %1090 = vrot.lane.b32.xlu0 %v3135_v11, %s3593_s22  ;;  %1026 = vrot.lane.b32.xlu1 %v3135_v11, %s2655_s23  ;;  %s3608_s22 = smov 112  }
 0x317   : > { %v2438_v13 = vpop.f32.mrf.mxu1 }
 0x318   : > { %v2241_v13 = vld [vmem:[%s3571_s8] ss:$0 sm:$0xff] }
 0x388   : > { %v1027_v14 = vpop.permute.xlu1 %1026  ;;  %v1091_v16 = vpop.permute.xlu0 %1090 }
 0x389   : > { %v1033_v15 = vsel %vm1028_vm2, %v1027_v14, 0  ;;  %v1097_v17 = vsel %vm1095_vm3, %v1091_v16, 0 }
 0x38a   : > { %2440 = vmatpush3.bf16.xpose.msra.mxu1 %v1033_v15 }
 0x38b   : > { %2445 = vmatprep.subr.bf16.mxu1 %v2652_v57 }
 0x391   : > { %2442 = vmatmul.mubr.msk.bf16.vlgmr.msra.gmra.mxu1 %vm1028_vm2, %v3135_v11 }
 0x392   : > { %2446 = vmatpush3.bf16.msra.mxu1 %v1097_v17  ;;  %2447 = vmatprep.mubr.msk.bf16.mxu1 %vm2653_vm1, %v2652_v57 }
 0x393   : > { %2451 = vmatprep.subr.bf16.mxu1 %v2652_v57 }
 0x451   : > { %v1069_v20 = vpop.f32.mrf.mxu1 }
 0x452   : > { %v1075_v21 = vmul.f32 0.25, %v1069_v20 }
 0x453   : > { %v2443_v22 = vpop.f32.mrf.mxu1 }
 0x454   : > { %v1076_v23 = vsel %vm935_vm4, %v1075_v21, -1e+30 }
 0x455   : > { %v1072_v24 = vpop.f32.mrf.mxu1  ;;  %v1078_v25 = vsel %vm1077_vm5, %v1076_v23, -inf }
 0x456   : > { %1079 = vmax.xlane.f32.xlu1 %v1078_v25 }
 0x457   : > { %v2444_v26 = vpop.f32.mrf.mxu1 }
 0x458   : > { %v1347_v26 = vld [vmem:[%s3574_s11 + $0x18] sm:$0xff] }
 0x4df   : > { %v1080_v27 = vpop.xlane.xlu1 %1079 }
 0x4e0   : > { %v1081_v28 = vsub.f32 %v1076_v23, %v1080_v27 }
 0x4e2   : > { %v1082_v29 = vmul.f32 1.442695, %v1081_v28  ;;  %v1344_v28 = vld [vmem:[%s3574_s11] sm:$0xff] }
 0x4e4   : > { %2616 = vpow2.f32 %v1082_v29  ;;  %v1345_v29 = vld [vmem:[%s3574_s11 + $0x8] sm:$0xff] }
 0x4f1   : > { %v2617_v30 = vpop.eup %2616 }
 0x4f2   : > { %v1084_v31 = vsel %vm1077_vm5, %v2617_v30, 0.0 }
 0x4f3   : > { %1085 = vadd.xlane.f32.xlu0 %v1084_v31 }
 0x509   : > { %1141 = vrot.lane.b32.xlu0 %v3135_v11, %s3590_s1 }
 0x50d   : > { %1139 = vrot.lane.b32.xlu0 %v3135_v11, %s3591_s25 }
 0x57c   : > { %v1086_v32 = vpop.xlane.xlu0 %1085 }
 0x57d   : > { %2618 = vrcp.f32 %v1086_v32 }
 0x580   : > { %v1142_v35 = vpop.permute.xlu0 %1141 }
 0x581   : > { %v1147_v37 = vsel %vm1028_vm2, %v1142_v35, 0  ;;  %v2242_v35 = vld [vmem:[%s3572_s9] ss:$0 sm:$0xff] }
 0x584   : > { %v1140_v38 = vpop.permute.xlu0 %1139 }
 0x58a   : > { %v2619_v33 = vpop.eup %2618 }
 0x58b   : > { %v1088_v34 = vmul.f32 %v2619_v33, %v2617_v30  ;;  %v1349_v30 = vpack.c.bf16 %v1345_v29, %v1344_v28 }
 0x58d   : > { %v1089_v36 = vpack.c.bf16 %v1088_v34, %v1088_v34 }
 0x58f   : > { %2448 = vmatmul.mubr.msk.bf16.vlgmr.msra.gmra.mxu1 %vm1077_vm5, %v1089_v36 }
 0x590   : > { %2452 = vmatpush3.bf16.xpose.msra.mxu1 %v1147_v37  ;;  %2453 = vmatprep.mubr.msk.bf16.mxu1 %vm2653_vm1, %v2652_v57  ;;  %v2243_v37 = vld [vmem:[%s3573_s10] ss:$0 sm:$0xff] }
 0x591   : > { %2463 = vmatprep.subr.bf16.mxu1 %v2652_v57 }
 0x597   : > { %2454 = vmatmul.mubr.msk.bf16.vlgmr.msra.gmra.mxu1 %vm1028_vm2, %v1140_v38 }
 0x598   : > { %2467 = vmatprep.mubr.msk.bf16.mxu1 %vm2653_vm1, %v2652_v57  ;;  %2464 = vmatpush3.bf16.msra.mxu1 %v1262_v1  ;;  %v1411_v1 = vld [vmem:[%s3576_s13 + $0x8] sm:$0xff] }
 0x599   : > { %2465 = vmatprep.subr.bf16.mxu1 %v2652_v57  ;;  %v1427_v2 = vpack.c.bf16 %v1411_v1, %v1410_v0 }
 0x59c   : > { %2466 = vmatpush3.bf16.msra.mxu1 %v1261_v4 }
 0x59d   : > { %2479 = vmatprep.subr.bf16.mxu1 %v2652_v57 }
 0x64f   : > { %v1133_v39 = vpop.f32.mrf.mxu1 }
 0x651   : > { %v2449_v40 = vpop.f32.mrf.mxu1 }
 0x653   : > { %v1136_v41 = vpop.f32.mrf.mxu1 }
 0x654   : > { %v1424_v41 = vld [vmem:[%s3576_s13 + $0x70] sm:$0xff] }
 0x655   : > { %v2450_v42 = vpop.f32.mrf.mxu1 }
 0x656   : > { %v1425_v42 = vld [vmem:[%s3576_s13 + $0x78] sm:$0xff] }
 0x657   : > { %v1183_v43 = vpop.f32.mrf.mxu1 }
 0x658   : > { %v1189_v44 = vmul.f32 0.25, %v1183_v43  ;;  %v1434_v43 = vpack.c.bf16 %v1425_v42, %v1424_v41  ;;  %v2249_v42 = vld [vmem:[%s3605_s20 + $0x1] ss:$0 sm:$0xff] }
 0x659   : > { %v2455_v45 = vpop.f32.mrf.mxu1 }
 0x65a   : > { %v1190_v47 = vsel %vm935_vm4, %v1189_v44, -1e+30  ;;  %v1422_v44 = vld [vmem:[%s3576_s13 + $0x60] sm:$0xff]  ;;  %v1423_v45 = vld [vmem:[%s3576_s13 + $0x68] sm:$0xff] }
 0x65b   : > { %v1186_v48 = vpop.f32.mrf.mxu1  ;;  %v1191_v49 = vsel %vm1077_vm5, %v1190_v47, -inf }
 0x65c   : > { %1192 = vmax.xlane.f32.xlu1 %v1191_v49  ;;  %v1420_v48 = vld [vmem:[%s3576_s13 + $0x50] sm:$0xff]  ;;  %v1421_v49 = vld [vmem:[%s3576_s13 + $0x58] sm:$0xff] }
 0x65d   : > { %v2456_v50 = vpop.f32.mrf.mxu1 }
 0x65e   : > { %v1432_v50 = vpack.c.bf16 %v1421_v49, %v1420_v48  ;;  %v2256_v49 = vld [vmem:[%s3569_s6 + $0x1] ss:$0 sm:$0xff] }
 0x66d   : > { %1203 = vrot.lane.b32.xlu1 %v3135_v11, %s3589_s3 }
 0x6e5   : > { %v1193_v51 = vpop.xlane.xlu1 %1192 }
 0x6e6   : > { %v1194_v52 = vsub.f32 %v1190_v47, %v1193_v51  ;;  %v1433_v47 = vpack.c.bf16 %v1423_v45, %v1422_v44  ;;  %v1418_v51 = vld [vmem:[%s3576_s13 + $0x40] sm:$0xff] }
 0x6e7   : > { %v2250_v44 = vld [vmem:[%s3606_s30 + $0x1] ss:$0 sm:$0xff] }
 0x6e8   : > { %v1195_v53 = vmul.f32 1.442695, %v1194_v52  ;;  %v1419_v52 = vld [vmem:[%s3576_s13 + $0x48] sm:$0xff] }
 0x6e9   : > { %v1204_v54 = vpop.permute.xlu1 %1203 }
 0x6ea   : > { %2620 = vpow2.f32 %v1195_v53  ;;  %v1209_v55 = vsel %vm1095_vm3, %v1204_v54, 0  ;;  %v1431_v53 = vpack.c.bf16 %v1419_v52, %v1418_v51  ;;  %v1416_v54 = vld [vmem:[%s3576_s13 + $0x30] sm:$0xff] }
 0x6eb   : > { %2458 = vmatpush3.bf16.msra.mxu0 %v1209_v55  ;;  %v1417_v55 = vld [vmem:[%s3576_s13 + $0x38] sm:$0xff] }
 0x6ec   : > { %2471 = vmatprep.subr.bf16.mxu0 %v2652_v57 }
 0x6f7   : > { %v2621_v56 = vpop.eup %2620 }
 0x6f8   : > { %v1197_v58 = vsel %vm1077_vm5, %v2621_v56, 0.0 }
 0x6f9   : > { %1198 = vadd.xlane.f32.xlu0 %v1197_v58  ;;  %v1414_v58 = vld [vmem:[%s3576_s13 + $0x20] sm:$0xff] }
 0x782   : > { %v1199_v59 = vpop.xlane.xlu0 %1198 }
 0x783   : > { %2622 = vrcp.f32 %v1199_v59  ;;  %v1415_v59 = vld [vmem:[%s3576_s13 + $0x28] sm:$0xff] }
 0x790   : > { %v2623_v60 = vpop.eup %2622 }
 0x791   : > { %v1201_v61 = vmul.f32 %v2623_v60, %v2621_v56  ;;  %v1430_v56 = vpack.c.bf16 %v1417_v55, %v1416_v54  ;;  %v1429_v60 = vpack.c.bf16 %v1415_v59, %v1414_v58 }
 0x793   : > { %v1202_v62 = vpack.c.bf16 %v1201_v61, %v1201_v61  ;;  %v1412_v61 = vld [vmem:[%s3576_s13 + $0x10] sm:$0xff] }
 0x795   : > { %2460 = vmatmul.mubr.msk.bf16.vlgmr.msra.gmra.mxu0 %vm1077_vm5, %v1202_v62  ;;  %v1413_v62 = vld [vmem:[%s3576_s13 + $0x18] sm:$0xff] }
 0x796   : > { %2475 = vmatprep.mubr.msk.bf16.mxu0 %vm2653_vm1, %v2652_v57  ;;  %v1428_v63 = vpack.c.bf16 %v1413_v62, %v1412_v61 }
 0x855   : > { %v1245_v5 = vpop.f32.mrf.mxu0 }
 0x856   : > { %1252 = vrot.lane.b32.xlu1 %v1245_v5, %s3592_s28  ;;  %s3610_s28 = smov 48  }
 0x857   : > { %v2461_v6 = vpop.f32.mrf.mxu0 }
 0x859   : > { %v1248_v7 = vpop.f32.mrf.mxu0 }
 0x85b   : > { %v2462_v8 = vpop.f32.mrf.mxu0 }
 0x8c8   : > { %v1253_v9 = vpop.permute.xlu1 %1252 }
 0x8c9   : > { %v1255_v10 = vsel %vm1028_vm2, %v1133_v39, %v1253_v9 }
 0x8ca   : > { %v1260_v11 = vpack.c.bf16 %v1255_v10, %v1255_v10 }
 0x8cc   : > { %2468 = vmatmul.mubr.msk.bf16.vlgmr.msra.gmra.mxu1 %vm938_vm0, %v1260_v11 }
 0x8cd   : > { %2495 = vmatprep.mubr.msk.bf16.mxu1 %vm2653_vm1, %v2652_v57  ;;  %2480 = vmatpush3.bf16.msra.mxu1 %v1434_v43 }
 0x8ce   : > { %2481 = vmatprep.subr.bf16.mxu1 %v2652_v57 }
 0x8d1   : > { %2482 = vmatpush3.bf16.msra.mxu1 %v1433_v47 }
 0x8d2   : > { %2483 = vmatprep.subr.bf16.mxu1 %v2652_v57 }
 0x8d5   : > { %2484 = vmatpush3.bf16.msra.mxu1 %v1432_v50 }
 0x8d6   : > { %2485 = vmatprep.subr.bf16.mxu1 %v2652_v57 }
 0x8d9   : > { %2486 = vmatpush3.bf16.msra.mxu1 %v1431_v53 }
 0x8da   : > { %2487 = vmatprep.subr.bf16.mxu1 %v2652_v57 }
 0x8dd   : > { %2488 = vmatpush3.bf16.msra.mxu1 %v1430_v56 }
 0x8de   : > { %2489 = vmatprep.subr.bf16.mxu1 %v2652_v57 }
 0x8e1   : > { %2490 = vmatpush3.bf16.msra.mxu1 %v1429_v60 }
 0x8e2   : > { %2491 = vmatprep.subr.bf16.mxu1 %v2652_v57 }
 0x8e5   : > { %2492 = vmatpush3.bf16.msra.mxu1 %v1428_v63 }
 0x8e6   : > { %2493 = vmatprep.subr.bf16.mxu1 %v2652_v57 }
 0x8e9   : > { %2494 = vmatpush3.bf16.msra.mxu1 %v1427_v2 }
 0x8ea   : > { %2525 = vmatprep.subr.bf16.mxu1 %v2652_v57 }
 0x98c   : > { %v1300_v12 = vpop.f32.mrf.mxu1 }
 0x98d   : > { %v1306_v14 = vadd.f32 %v1300_v12, %v3097_v46  ;;  %v1346_v46 = vld [vmem:[%s3574_s11 + $0x10] sm:$0xff] }
 0x98e   : > { %v2469_v15 = vpop.f32.mrf.mxu1  ;;  %v1350_v27 = vpack.c.bf16 %v1347_v26, %v1346_v46 }
 0x98f   : > { %v3202_v16 = vadd.f32 %v2241_v13, %v1306_v14 }
 0x990   : > { %v1303_v17 = vpop.f32.mrf.mxu1  ;;  %2472 = vmatpush3.bf16.msra.mxu0 %v1350_v27 }
 0x991   : > { %v1317_v18 = vsel %vm938_vm0, %v3202_v16, 0.0  ;;  %2473 = vmatprep.subr.bf16.mxu0 %v2652_v57 }
 0x992   : > { %1318 = vadd.xlane.f32.xlu1 %v1317_v18  ;;  %v2470_v20 = vpop.f32.mrf.mxu1 }
 0x994   : > { %2474 = vmatpush3.bf16.msra.mxu0 %v1349_v30 }
 0x995   : > { %2499 = vmatprep.subr.bf16.mxu0 %v2652_v57 }
 0xa1b   : > { %v1319_v21 = vpop.xlane.xlu1 %1318 }
 0xa1c   : > { %v1320_v22 = vmul.f32 0.03125, %v1319_v21  ;;  %v2246_v21 = vld [vmem:[%s3577_s14] ss:$0 sm:$0xff] }
 0xa1e   : > { %v1321_v23 = vsub.f32 %v3202_v16, %v1320_v22 }
 0xa20   : > { %v1322_v24 = vmul.f32 %v1321_v23, %v1321_v23 }
 0xa22   : > { %v1323_v25 = vsel %vm938_vm0, %v1322_v24, 0.0 }
 0xa23   : > { %1324 = vadd.xlane.f32.xlu0 %v1323_v25 }
 0xaac   : > { %v1325_v31 = vpop.xlane.xlu0 %1324 }
 0xaad   : > { %v1326_v32 = vmul.f32 0.03125, %v1325_v31 }
 0xaaf   : > { %v1327_v33 = vadd.f32 1e-12, %v1326_v32 }
 0xab1   : > { %2624 = vrsqrt.f32 %v1327_v33  ;;  %v2253_v33 = vld [vmem:[%s3604_s24 + $0x30] sm:$0xff] }
 0xabe   : > { %v2625_v34 = vpop.eup %2624 }
 0xabf   : > { %v1329_v36 = vmul.f32 %v2625_v34, %v1321_v23 }
 0xac1   : > { %v1336_v38 = vmul.f32 %v2242_v35, %v1329_v36  ;;  %v2251_v35 = vld [vmem:[%s3604_s24 + $0x20] sm:$0xff]  ;;  %v2252_v36 = vld [vmem:[%s3604_s24 + $0x28] sm:$0xff] }
 0xac3   : > { %v1343_v39 = vadd.f32 %v2243_v37, %v1336_v38  ;;  %v1520_v37 = vpack.c.bf16 %v2252_v36, %v2251_v35 }
 0xac5   : > { %v1348_v40 = vpack.c.bf16 %v1343_v39, %v1343_v39 }
 0xac7   : > { %2476 = vmatmul.mubr.msk.bf16.vlgmr.msra.gmra.mxu0 %vm938_vm0, %v1348_v40 }
 0xac8   : > { %2503 = vmatprep.mubr.msk.bf16.mxu0 %vm2653_vm1, %v2652_v57 }
 0xb87   : > { %v1395_v4 = vpop.f32.mrf.mxu0 }
 0xb88   : > { %v1396_v5 = vadd.f32 %v2244_v3, %v1395_v4 }
 0xb89   : > { %v2477_v6 = vpop.f32.mrf.mxu0 }
 0xb8a   : > { %v1401_v7 = vmul.f32 %v1396_v5, %v1396_v5 }
 0xb8b   : > { %v1398_v8 = vpop.f32.mrf.mxu0 }
 0xb8c   : > { %v1402_v9 = vmul.f32 %v1401_v7, %v1396_v5 }
 0xb8d   : > { %v2478_v10 = vpop.f32.mrf.mxu0 }
 0xb8e   : > { %v1403_v11 = vmul.f32 0.044715, %v1402_v9 }
 0xb90   : > { %v1404_v12 = vadd.f32 %v1403_v11, %v1396_v5 }
 0xb92   : > { %v1405_v13 = vmul.f32 0.7978846, %v1404_v12 }
 0xb94   : > { %2626 = vtanh.f32 %v1405_v13 }
 0xba1   : > { %v2627_v14 = vpop.eup %2626 }
 0xba2   : > { %v1407_v15 = vadd.f32 1.0, %v2627_v14 }
 0xba4   : > { %v1408_v17 = vmul.f32 0.5, %v1407_v15 }
 0xba6   : > { %v1409_v18 = vmul.f32 %v1408_v17, %v1396_v5 }
 0xba8   : > { %v1426_v20 = vpack.c.bf16 %v1409_v18, %v1409_v18 }
 0xbaa   : > { %2496 = vmatmul.mubr.bf16.vlgmr.msra.gmra.mxu1 %v1426_v20 }
 0xbab   : > { %2527 = vmatprep.mubr.msk.bf16.mxu1 %vm2653_vm1, %v2652_v57 }
 0xc6a   : > { %v1476_v22 = vpop.f32.mrf.mxu1 }
 0xc6b   : > { %v1477_v23 = vadd.f32 %v2246_v21, %v1476_v22 }
 0xc6c   : > { %v2497_v24 = vpop.f32.mrf.mxu1 }
 0xc6d   : > { %v3296_v25 = vadd.f32 %v1477_v23, %v3202_v16  ;;  %v2254_v16 = vld [vmem:[%s3604_s24 + $0x38] sm:$0xff] }
 0xc6e   : > { %v1479_v46 = vpop.f32.mrf.mxu1  ;;  %v1521_v34 = vpack.c.bf16 %v2254_v16, %v2253_v33 }
 0xc6f   : > { %v1487_v26 = vsel %vm938_vm0, %v3296_v25, 0.0 }
 0xc70   : > { %1488 = vadd.xlane.f32.xlu0 %v1487_v26  ;;  %v2498_v27 = vpop.f32.mrf.mxu1  ;;  %2500 = vmatpush3.bf16.msra.mxu0 %v1521_v34 }
 0xc71   : > { %2501 = vmatprep.subr.bf16.mxu0 %v2652_v57 }
 0xc74   : > { %2502 = vmatpush3.bf16.msra.mxu0 %v1520_v37 }
 0xc75   : > { %2507 = vmatprep.subr.bf16.mxu0 %v2652_v57 }
 0xcf9   : > { %v1489_v28 = vpop.xlane.xlu0 %1488 }
 0xcfa   : > { %v1490_v29 = vmul.f32 0.03125, %v1489_v28 }
 0xcfc   : > { %v1491_v30 = vsub.f32 %v3296_v25, %v1490_v29 }
 0xcfe   : > { %v1492_v31 = vmul.f32 %v1491_v30, %v1491_v30 }
 0xd00   : > { %v1493_v32 = vsel %vm938_vm0, %v1492_v31, 0.0 }
 0xd01   : > { %1494 = vadd.xlane.f32.xlu0 %v1493_v32 }
 0xd8a   : > { %v1495_v38 = vpop.xlane.xlu0 %1494 }
 0xd8b   : > { %v1496_v39 = vmul.f32 0.03125, %v1495_v38  ;;  %v2264_v38 = vld [vmem:[%s3570_s7 + $0x30] sm:$0xff] }
 0xd8d   : > { %v1497_v40 = vadd.f32 1e-12, %v1496_v39  ;;  %v2265_v39 = vld [vmem:[%s3570_s7 + $0x38] sm:$0xff] }
 0xd8f   : > { %2628 = vrsqrt.f32 %v1497_v40  ;;  %v1809_v40 = vpack.c.bf16 %v2265_v39, %v2264_v38  ;;  %v2280_v38 = vld [vmem:[%s3576_s13 + $0x80] sm:$0xff]  ;;  %v2281_v39 = vld [vmem:[%s3576_s13 + $0x88] sm:$0xff] }
 0xd9c   : > { %v2629_v41 = vpop.eup %2628 }
 0xd9d   : > { %v1499_v43 = vmul.f32 %v2629_v41, %v1491_v30  ;;  %v2262_v41 = vld [vmem:[%s3570_s7 + $0x20] sm:$0xff] }
 0xd9f   : > { %v1506_v45 = vmul.f32 %v2249_v42, %v1499_v43  ;;  %v2263_v42 = vld [vmem:[%s3570_s7 + $0x28] sm:$0xff] }
 0xda0   : > { %v1808_v43 = vpack.c.bf16 %v2263_v42, %v2262_v41  ;;  %v2278_v41 = vld [vmem:[%s3575_s12 + $0x1] ss:$0 sm:$0xff] }
 0xda1   : > { %v1513_v47 = vadd.f32 %v2250_v44, %v1506_v45 }
 0xda3   : > { %v1519_v48 = vpack.c.bf16 %v1513_v47, %v1513_v47 }
 0xda5   : > { %2504 = vmatmul.mubr.msk.bf16.vlgmr.msra.gmra.mxu0 %vm938_vm0, %v1519_v48 }
 0xda6   : > { %2509 = vmatprep.mubr.msk.bf16.mxu0 %vm2653_vm1, %v2652_v57 }
 0xe65   : > { %v1567_v50 = vpop.f32.mrf.mxu0 }
 0xe66   : > { %v1568_v51 = vadd.f32 %v2256_v49, %v1567_v50 }
 0xe67   : > { %v2505_v52 = vpop.f32.mrf.mxu0 }
 0xe68   : > { %v1573_v53 = vpack.c.bf16 %v1568_v51, %v1568_v51 }
 0xe69   : > { %v1570_v54 = vpop.f32.mrf.mxu0 }
 0xe6a   : > { %1575 = vrot.lane.b32.xlu0 %v1573_v53, %s2655_s23  ;;  %s3609_s23 = smov 80  }
 0xe6b   : > { %v2506_v55 = vpop.f32.mrf.mxu0 }
 0xe6e   : > { %1637 = vrot.lane.b32.xlu0 %v1573_v53, %s3607_s2 }
 0xe72   : > { %1685 = vrot.lane.b32.xlu0 %v1573_v53, %s3608_s22  ;;  %s654_s22 = scalar_lea.vmem %s3584_s21, %s3613_s27 }
 0xedc   : > { %v1576_v56 = vpop.permute.xlu0 %1575 }
 0xedd   : > { %v1581_v58 = vsel %vm1028_vm2, %v1576_v56, 0 }
 0xede   : > { %2508 = vmatpush3.bf16.xpose.msra.mxu0 %v1581_v58 }
 0xedf   : > { %2513 = vmatprep.subr.bf16.mxu0 %v2652_v57 }
 0xee0   : > { %v1638_v59 = vpop.permute.xlu0 %1637 }
 0xee1   : > { %v1643_v60 = vsel %vm1095_vm3, %v1638_v59, 0 }
 0xee4   : > { %v1686_v15 = vpop.permute.xlu0 %1685 }
 0xee5   : > { %2510 = vmatmul.mubr.msk.bf16.vlgmr.msra.gmra.mxu0 %vm1028_vm2, %v1573_v53 }
 0xee6   : > { %2514 = vmatpush3.bf16.msra.mxu0 %v1643_v60  ;;  %2515 = vmatprep.mubr.msk.bf16.mxu0 %vm2653_vm1, %v2652_v57 }
 0xee7   : > { %2519 = vmatprep.subr.bf16.mxu0 %v2652_v57 }
 0xfa5   : > { %v1617_v61 = vpop.f32.mrf.mxu0 }
 0xfa6   : > { %v1623_v62 = vmul.f32 0.25, %v1617_v61 }
 0xfa7   : > { %v2511_v63 = vpop.f32.mrf.mxu0 }
 0xfa8   : > { %v1624_v0 = vsel %vm935_vm4, %v1623_v62, -1e+30 }
 0xfa9   : > { %v1620_v1 = vpop.f32.mrf.mxu0  ;;  %v1625_v2 = vsel %vm1077_vm5, %v1624_v0, -inf }
 0xfaa   : > { %1626 = vmax.xlane.f32.xlu1 %v1625_v2  ;;  %v2276_v2 = vld [vmem:[%s3574_s11 + $0x38] sm:$0xff] }
 0xfab   : > { %v2512_v3 = vpop.f32.mrf.mxu0 }
0x1033   : > { %v1627_v4 = vpop.xlane.xlu1 %1626 }
0x1034   : > { %v1628_v5 = vsub.f32 %v1624_v0, %v1627_v4  ;;  %v2273_v4 = vld [vmem:[%s3574_s11 + $0x20] sm:$0xff] }
0x1036   : > { %v1629_v6 = vmul.f32 1.442695, %v1628_v5  ;;  %v2274_v5 = vld [vmem:[%s3574_s11 + $0x28] sm:$0xff] }
0x1038   : > { %2630 = vpow2.f32 %v1629_v6  ;;  %v1900_v6 = vpack.c.bf16 %v2274_v5, %v2273_v4 }
0x1045   : > { %v2631_v7 = vpop.eup %2630 }
0x1046   : > { %v1631_v8 = vsel %vm1077_vm5, %v2631_v7, 0.0 }
0x1047   : > { %1632 = vadd.xlane.f32.xlu1 %v1631_v8 }
0x1058   : > { %1687 = vrot.lane.b32.xlu1 %v1573_v53, %s3609_s23  ;;  %s3611_s23 = smov 16  }
0x10d0   : > { %v1633_v9 = vpop.xlane.xlu1 %1632 }
0x10d1   : > { %2632 = vrcp.f32 %v1633_v9 }
0x10d4   : > { %v1688_v12 = vpop.permute.xlu1 %1687 }
0x10d5   : > { %v1693_v14 = vsel %vm1028_vm2, %v1688_v12, 0 }
0x10de   : > { %v2633_v10 = vpop.eup %2632 }
0x10df   : > { %v1635_v11 = vmul.f32 %v2633_v10, %v2631_v7 }
0x10e1   : > { %v1636_v13 = vpack.c.bf16 %v1635_v11, %v1635_v11  ;;  %v2271_v11 = vld [vmem:[%s3572_s9 + $0x1] ss:$0 sm:$0xff] }
0x10e3   : > { %2516 = vmatmul.mubr.msk.bf16.vlgmr.msra.gmra.mxu0 %vm1077_vm5, %v1636_v13  ;;  %v2272_v13 = vld [vmem:[%s3573_s10 + $0x1] ss:$0 sm:$0xff] }
0x10e4   : > { %2520 = vmatpush3.bf16.xpose.msra.mxu0 %v1693_v14  ;;  %2521 = vmatprep.mubr.msk.bf16.mxu0 %vm2653_vm1, %v2652_v57 }
0x10e5   : > { %2531 = vmatprep.subr.bf16.mxu0 %v2652_v57 }
0x10eb   : > { %2522 = vmatmul.mubr.msk.bf16.vlgmr.msra.gmra.mxu0 %vm1028_vm2, %v1686_v15 }
0x10ec   : > { %2535 = vmatprep.mubr.msk.bf16.mxu0 %vm2653_vm1, %v2652_v57  ;;  %2532 = vmatpush3.bf16.msra.mxu0 %v1809_v40  ;;  %v1980_v40 = vpack.c.bf16 %v2281_v39, %v2280_v38  ;;  %v2111_v38 = vld [vmem:[%s3582_s19 + $0x20] sm:$0xff]  ;;  %v2112_v39 = vld [vmem:[%s3582_s19 + $0x28] sm:$0xff] }
0x10ed   : > { %2533 = vmatprep.subr.bf16.mxu0 %v2652_v57 }
0x10f0   : > { %2534 = vmatpush3.bf16.msra.mxu0 %v1808_v43 }
0x10f1   : > { %2547 = vmatprep.subr.bf16.mxu0 %v2652_v57 }
0x11a3   : > { %v1679_v17 = vpop.f32.mrf.mxu0 }
0x11a5   : > { %v2517_v18 = vpop.f32.mrf.mxu0 }
0x11a6   : > { %v2294_v18 = vld [vmem:[%s3576_s13 + $0xf0] sm:$0xff] }
0x11a7   : > { %v1682_v20 = vpop.f32.mrf.mxu0 }
0x11a8   : > { %v2295_v20 = vld [vmem:[%s3576_s13 + $0xf8] sm:$0xff] }
0x11a9   : > { %v2518_v21 = vpop.f32.mrf.mxu0 }
0x11aa   : > { %v1987_v21 = vpack.c.bf16 %v2295_v20, %v2294_v18  ;;  %v2037_v18 = vld [vmem:[%s3578_s15] sm:$0x1] }
0x11ab   : > { %v1729_v22 = vpop.f32.mrf.mxu0 }
0x11ac   : > { %v1735_v23 = vmul.f32 0.25, %v1729_v22  ;;  %v2292_v22 = vld [vmem:[%s3576_s13 + $0xe0] sm:$0xff] }
0x11ad   : > { %v2523_v24 = vpop.f32.mrf.mxu0 }
0x11ae   : > { %v1736_v46 = vsel %vm935_vm4, %v1735_v23, -1e+30  ;;  %v2293_v23 = vld [vmem:[%s3576_s13 + $0xe8] sm:$0xff] }
0x11af   : > { %v1732_v26 = vpop.f32.mrf.mxu0  ;;  %v1737_v27 = vsel %vm1077_vm5, %v1736_v46, -inf  ;;  %v1986_v24 = vpack.c.bf16 %v2293_v23, %v2292_v22  ;;  %v2121_v23 = vld [vmem:[%s3582_s19 + $0x70] sm:$0xff] }
0x11b0   : > { %1738 = vmax.xlane.f32.xlu0 %v1737_v27  ;;  %v2291_v26 = vld [vmem:[%s3576_s13 + $0xd8] sm:$0xff] }
0x11b1   : > { %v2524_v28 = vpop.f32.mrf.mxu0 }
0x11b2   : > { %v2288_v28 = vld [vmem:[%s3576_s13 + $0xc0] sm:$0xff] }
0x11c6   : > { %1749 = vrot.lane.b32.xlu0 %v1573_v53, %s3610_s28  ;;  %v2268_v53 = vld [vmem:[%s3571_s8 + $0x1] ss:$0 sm:$0xff] }
0x1239   : > { %v1739_v29 = vpop.xlane.xlu0 %1738 }
0x123a   : > { %v1740_v30 = vsub.f32 %v1736_v46, %v1739_v29  ;;  %v2290_v46 = vld [vmem:[%s3576_s13 + $0xd0] sm:$0xff]  ;;  %v2289_v29 = vld [vmem:[%s3576_s13 + $0xc8] sm:$0xff] }
0x123b   : > { %v1985_v27 = vpack.c.bf16 %v2291_v26, %v2290_v46 }
0x123c   : > { %v1741_v31 = vmul.f32 1.442695, %v1740_v30  ;;  %v1984_v30 = vpack.c.bf16 %v2289_v29, %v2288_v28  ;;  %v2119_v28 = vld [vmem:[%s3582_s19 + $0x60] sm:$0xff]  ;;  %v2120_v29 = vld [vmem:[%s3582_s19 + $0x68] sm:$0xff] }
0x123d   : > { %v1750_v32 = vpop.permute.xlu0 %1749 }
0x123e   : > { %2634 = vpow2.f32 %v1741_v31  ;;  %v1755_v33 = vsel %vm1095_vm3, %v1750_v32, 0  ;;  %v2286_v31 = vld [vmem:[%s3576_s13 + $0xb0] sm:$0xff]  ;;  %v2287_v32 = vld [vmem:[%s3576_s13 + $0xb8] sm:$0xff] }
0x123f   : > { %2526 = vmatpush3.bf16.msra.mxu1 %v1755_v33  ;;  %v1983_v33 = vpack.c.bf16 %v2287_v32, %v2286_v31  ;;  %v2117_v31 = vld [vmem:[%s3582_s19 + $0x50] sm:$0xff]  ;;  %v2118_v32 = vld [vmem:[%s3582_s19 + $0x58] sm:$0xff] }
0x1240   : > { %2539 = vmatprep.subr.bf16.mxu1 %v2652_v57 }
0x124b   : > { %v2635_v16 = vpop.eup %2634 }
0x124c   : > { %v1743_v19 = vsel %vm1077_vm5, %v2635_v16, 0.0 }
0x124d   : > { %1744 = vadd.xlane.f32.xlu1 %v1743_v19  ;;  %v2285_v19 = vld [vmem:[%s3576_s13 + $0xa8] sm:$0xff] }
0x12d6   : > { %v1745_v34 = vpop.xlane.xlu1 %1744 }
0x12d7   : > { %2636 = vrcp.f32 %v1745_v34 }
0x12e4   : > { %v2637_v35 = vpop.eup %2636 }
0x12e5   : > { %v1747_v36 = vmul.f32 %v2637_v35, %v2635_v16  ;;  %v2284_v16 = vld [vmem:[%s3576_s13 + $0xa0] sm:$0xff]  ;;  %v2282_v35 = vld [vmem:[%s3576_s13 + $0x90] sm:$0xff] }
0x12e6   : > { %v1982_v34 = vpack.c.bf16 %v2285_v19, %v2284_v16  ;;  %v2115_v16 = vld [vmem:[%s3582_s19 + $0x40] sm:$0xff]  ;;  %v2116_v19 = vld [vmem:[%s3582_s19 + $0x48] sm:$0xff] }
0x12e7   : > { %v1748_v37 = vpack.c.bf16 %v1747_v36, %v1747_v36  ;;  %v2283_v36 = vld [vmem:[%s3576_s13 + $0x98] sm:$0xff] }
0x12e9   : > { %2528 = vmatmul.mubr.msk.bf16.vlgmr.msra.gmra.mxu1 %vm1077_vm5, %v1748_v37  ;;  %v1981_v37 = vpack.c.bf16 %v2283_v36, %v2282_v35  ;;  %v2113_v35 = vld [vmem:[%s3582_s19 + $0x30] sm:$0xff]  ;;  %v2114_v36 = vld [vmem:[%s3582_s19 + $0x38] sm:$0xff] }
0x12ea   : > { %2543 = vmatprep.mubr.msk.bf16.mxu1 %vm2653_vm1, %v2652_v57 }
0x13a9   : > { %v1791_v44 = vpop.f32.mrf.mxu1 }
0x13aa   : > { %1798 = vrot.lane.b32.xlu1 %v1791_v44, %s3611_s23 }
0x13ab   : > { %v2529_v45 = vpop.f32.mrf.mxu1 }
0x13ad   : > { %v1794_v47 = vpop.f32.mrf.mxu1 }
0x13af   : > { %v2530_v48 = vpop.f32.mrf.mxu1 }
0x141c   : > { %v1799_v49 = vpop.permute.xlu1 %1798 }
0x141d   : > { %v1801_v50 = vsel %vm1028_vm2, %v1679_v17, %v1799_v49 }
0x141e   : > { %v1807_v51 = vpack.c.bf16 %v1801_v50, %v1801_v50 }
0x1420   : > { %2536 = vmatmul.mubr.msk.bf16.vlgmr.msra.gmra.mxu0 %vm938_vm0, %v1807_v51 }
0x1421   : > { %2563 = vmatprep.mubr.msk.bf16.mxu0 %vm2653_vm1, %v2652_v57  ;;  %2548 = vmatpush3.bf16.msra.mxu0 %v1987_v21  ;;  %v2038_v21 = vld [vmem:[%s3579_s16] sm:$0x1] }
0x1422   : > { %2549 = vmatprep.subr.bf16.mxu0 %v2652_v57 }
0x1425   : > { %2550 = vmatpush3.bf16.msra.mxu0 %v1986_v24  ;;  %v2122_v24 = vld [vmem:[%s3582_s19 + $0x78] sm:$0xff] }
0x1426   : > { %2551 = vmatprep.subr.bf16.mxu0 %v2652_v57  ;;  %v2131_v26 = vpack.c.bf16 %v2122_v24, %v2121_v23 }
0x1429   : > { %2552 = vmatpush3.bf16.msra.mxu0 %v1985_v27 }
0x142a   : > { %2553 = vmatprep.subr.bf16.mxu0 %v2652_v57 }
0x142d   : > { %2554 = vmatpush3.bf16.msra.mxu0 %v1984_v30  ;;  %v2130_v30 = vpack.c.bf16 %v2120_v29, %v2119_v28 }
0x142e   : > { %2555 = vmatprep.subr.bf16.mxu0 %v2652_v57 }
0x1431   : > { %2556 = vmatpush3.bf16.msra.mxu0 %v1983_v33  ;;  %v2129_v33 = vpack.c.bf16 %v2118_v32, %v2117_v31 }
0x1432   : > { %2557 = vmatprep.subr.bf16.mxu0 %v2652_v57 }
0x1435   : > { %2558 = vmatpush3.bf16.msra.mxu0 %v1982_v34  ;;  %v2128_v34 = vpack.c.bf16 %v2116_v19, %v2115_v16 }
0x1436   : > { %2559 = vmatprep.subr.bf16.mxu0 %v2652_v57 }
0x1439   : > { %2560 = vmatpush3.bf16.msra.mxu0 %v1981_v37  ;;  %v2127_v37 = vpack.c.bf16 %v2114_v36, %v2113_v35 }
0x143a   : > { %2561 = vmatprep.subr.bf16.mxu0 %v2652_v57 }
0x143d   : > { %2562 = vmatpush3.bf16.msra.mxu0 %v1980_v40  ;;  %v2126_v40 = vpack.c.bf16 %v2112_v39, %v2111_v38 }
0x14e0   : > { %v1847_v52 = vpop.f32.mrf.mxu0 }
0x14e1   : > { %v1853_v54 = vadd.f32 %v1847_v52, %v3296_v25  ;;  %v2275_v25 = vld [vmem:[%s3574_s11 + $0x30] sm:$0xff] }
0x14e2   : > { %v2537_v55 = vpop.f32.mrf.mxu0  ;;  %v1901_v3 = vpack.c.bf16 %v2276_v2, %v2275_v25 }
0x14e3   : > { %v3384_v56 = vadd.f32 %v2268_v53, %v1853_v54 }
0x14e4   : > { %v1850_v58 = vpop.f32.mrf.mxu0  ;;  %2540 = vmatpush3.bf16.msra.mxu1 %v1901_v3 }
0x14e5   : > { %v1867_v59 = vsel %vm938_vm0, %v3384_v56, 0.0  ;;  %2541 = vmatprep.subr.bf16.mxu1 %v2652_v57 }
0x14e6   : > { %1868 = vadd.xlane.f32.xlu0 %v1867_v59  ;;  %v2538_v60 = vpop.f32.mrf.mxu0 }
0x14e7   : > { %v2297_v60 = vld [vmem:[%s3577_s14 + $0x1] ss:$0 sm:$0xff] }
0x14e8   : > { %2542 = vmatpush3.bf16.msra.mxu1 %v1900_v6 }
0x14e9   : > { %2567 = vmatprep.subr.bf16.mxu1 %v2652_v57 }
0x156f   : > { %v1869_v61 = vpop.xlane.xlu0 %1868 }
0x1570   : > { %v1870_v62 = vmul.f32 0.03125, %v1869_v61 }
0x1572   : > { %v1871_v63 = vsub.f32 %v3384_v56, %v1870_v62 }
0x1574   : > { %v1872_v0 = vmul.f32 %v1871_v63, %v1871_v63 }
0x1576   : > { %v1873_v1 = vsel %vm938_vm0, %v1872_v0, 0.0 }
0x1577   : > { %1874 = vadd.xlane.f32.xlu1 %v1873_v1 }
0x1600   : > { %v1875_v7 = vpop.xlane.xlu1 %1874 }
0x1601   : > { %v1876_v8 = vmul.f32 0.03125, %v1875_v7 }
0x1603   : > { %v1877_v9 = vadd.f32 1e-12, %v1876_v8  ;;  %v2057_v8 = vld [vmem:[%s3580_s17 + $0x10] sm:$0xff] }
0x1605   : > { %2638 = vrsqrt.f32 %v1877_v9  ;;  %v2058_v9 = vld [vmem:[%s3580_s17 + $0x18] sm:$0xff] }
0x1612   : > { %v2639_v10 = vpop.eup %2638 }
0x1613   : > { %v1879_v12 = vmul.f32 %v2639_v10, %v1871_v63  ;;  %v2061_v10 = vpack.c.bf16 %v2058_v9, %v2057_v8 }
0x1615   : > { %v1886_v14 = vmul.f32 %v2271_v11, %v1879_v12  ;;  %v2056_v11 = vld [vmem:[%s3580_s17 + $0x8] sm:$0xff] }
0x1617   : > { %v1893_v15 = vadd.f32 %v2272_v13, %v1886_v14 }
0x1619   : > { %v1899_v17 = vpack.c.bf16 %v1893_v15, %v1893_v15 }
0x161b   : > { %2544 = vmatmul.mubr.msk.bf16.vlgmr.msra.gmra.mxu1 %vm938_vm0, %v1899_v17 }
0x161c   : > { %2571 = vmatprep.mubr.msk.bf16.mxu1 %vm2653_vm1, %v2652_v57  ;;  %2568 = vmatpush3.bf16.msra.mxu1 %v2061_v10 }
0x161d   : > { %2569 = vmatprep.subr.bf16.mxu1 %v2652_v57 }
0x16db   : > { %v1947_v42 = vpop.f32.mrf.mxu1 }
0x16dc   : > { %v1948_v43 = vadd.f32 %v2278_v41, %v1947_v42  ;;  %v2109_v41 = vld [vmem:[%s3582_s19 + $0x10] sm:$0xff]  ;;  %v2110_v42 = vld [vmem:[%s3582_s19 + $0x18] sm:$0xff] }
0x16dd   : > { %v2545_v44 = vpop.f32.mrf.mxu1 }
0x16de   : > { %v1953_v45 = vmul.f32 %v1948_v43, %v1948_v43  ;;  %v2107_v44 = vld [vmem:[%s3582_s19] sm:$0xff] }
0x16df   : > { %v1950_v47 = vpop.f32.mrf.mxu1 }
0x16e0   : > { %v1954_v48 = vmul.f32 %v1953_v45, %v1948_v43  ;;  %v2108_v45 = vld [vmem:[%s3582_s19 + $0x8] sm:$0xff] }
0x16e1   : > { %v2546_v49 = vpop.f32.mrf.mxu1  ;;  %v2124_v47 = vpack.c.bf16 %v2108_v45, %v2107_v44 }
0x16e2   : > { %v1955_v50 = vmul.f32 0.044715, %v1954_v48  ;;  %v2062_v48 = vld [vmem:[%s3581_s18] sm:$0x1] }
0x16e4   : > { %v1956_v51 = vadd.f32 %v1955_v50, %v1948_v43 }
0x16e6   : > { %v1957_v52 = vmul.f32 0.7978846, %v1956_v51 }
0x16e8   : > { %2640 = vtanh.f32 %v1957_v52 }
0x16f5   : > { %v2641_v53 = vpop.eup %2640 }
0x16f6   : > { %v1959_v54 = vadd.f32 1.0, %v2641_v53 }
0x16f8   : > { %v1960_v55 = vmul.f32 0.5, %v1959_v54 }
0x16fa   : > { %v1961_v58 = vmul.f32 %v1960_v55, %v1948_v43  ;;  %v2125_v43 = vpack.c.bf16 %v2110_v42, %v2109_v41  ;;  %v2660_v55 = vmov 0  }
0x16fb   : > { %2613 = vset.pattern.permute.xlu0 %v2660_v55 }
0x16fc   : > { %v1979_v59 = vpack.c.bf16 %v1961_v58, %v1961_v58  ;;  %v2132_v58 = vld [vmem:[#allocation2] sm:$0x1] }
0x16fe   : > { %2564 = vmatmul.mubr.bf16.vlgmr.msra.gmra.mxu0 %v1979_v59 }
0x17be   : > { %v2030_v61 = vpop.f32.mrf.mxu0 }
0x17bf   : > { %v2031_v62 = vadd.f32 %v2297_v60, %v2030_v61 }
0x17c0   : > { %v2565_v63 = vpop.f32.mrf.mxu0 }
0x17c1   : > { %v2036_v0 = vadd.f32 %v2031_v62, %v3384_v56  ;;  %v2055_v56 = vld [vmem:[%s3580_s17] sm:$0xff] }
0x17c2   : > { %v2033_v1 = vpop.f32.mrf.mxu0  ;;  %v2060_v12 = vpack.c.bf16 %v2056_v11, %v2055_v56 }
0x17c3   : > { %v2040_v25 = vsel %vm2039_vm6, %v2036_v0, 0.0 }
0x17c4   : > { %2041 = vadd.xlane.f32.xlu0 %v2040_v25  ;;  %v2566_v2 = vpop.f32.mrf.mxu0  ;;  %2570 = vmatpush3.bf16.msra.mxu1 %v2060_v12 }
0x17c5   : > { %2575 = vmatprep.subr.bf16.mxu1 %v2652_v57 }
0x184d   : > { %v2042_v3 = vpop.xlane.xlu0 %2041 }
0x184e   : > { %v2043_v4 = vmul.f32 0.03125, %v2042_v3 }
0x1850   : > { %v2044_v5 = vsub.f32 %v2036_v0, %v2043_v4 }
0x1852   : > { %v2045_v6 = vmul.f32 %v2044_v5, %v2044_v5 }
0x1854   : > { %v2046_v7 = vsel %vm2039_vm6, %v2045_v6, 0.0 }
0x1855   : > { %2047 = vadd.xlane.f32.xlu0 %v2046_v7 }
0x18de   : > { %v2048_v13 = vpop.xlane.xlu0 %2047 }
0x18df   : > { %v2049_v14 = vmul.f32 0.03125, %v2048_v13 }
0x18e1   : > { %v2050_v15 = vadd.f32 1e-12, %v2049_v14 }
0x18e3   : > { %2642 = vrsqrt.f32 %v2050_v15 }
0x18f0   : > { %v2643_v17 = vpop.eup %2642 }
0x18f1   : > { %v2052_v20 = vmul.f32 %v2643_v17, %v2044_v5 }
0x18f3   : > { %v2053_v22 = vmul.f32 %v2052_v20, %v2037_v18 }
0x18f5   : > { %v2054_v46 = vadd.f32 %v2053_v22, %v2038_v21 }
0x18f7   : > { %v2059_v27 = vpack.c.bf16 %v2054_v46, %v2054_v46 }
0x18f9   : > { %2572 = vmatmul.mubr.msk.bf16.vlgmr.msra.gmra.mxu1 %vm938_vm0, %v2059_v27 }
0x18fa   : > { %2576 = vmatpush3.bf16.msra.mxu1 %v2131_v26  ;;  %2591 = vmatprep.mubr.msk.bf16.mxu1 %vm2653_vm1, %v2652_v57 }
0x18fb   : > { %2577 = vmatprep.subr.bf16.mxu1 %v2652_v57 }
0x18fe   : > { %2578 = vmatpush3.bf16.msra.mxu1 %v2130_v30 }
0x18ff   : > { %2579 = vmatprep.subr.bf16.mxu1 %v2652_v57 }
0x1902   : > { %2580 = vmatpush3.bf16.msra.mxu1 %v2129_v33 }
0x1903   : > { %2581 = vmatprep.subr.bf16.mxu1 %v2652_v57 }
0x1906   : > { %2582 = vmatpush3.bf16.msra.mxu1 %v2128_v34 }
0x1907   : > { %2583 = vmatprep.subr.bf16.mxu1 %v2652_v57 }
0x190a   : > { %2584 = vmatpush3.bf16.msra.mxu1 %v2127_v37 }
0x190b   : > { %2585 = vmatprep.subr.bf16.mxu1 %v2652_v57 }
0x190e   : > { %2586 = vmatpush3.bf16.msra.mxu1 %v2126_v40 }
0x190f   : > { %2587 = vmatprep.subr.bf16.mxu1 %v2652_v57 }
0x1912   : > { %2588 = vmatpush3.bf16.msra.mxu1 %v2125_v43 }
0x1913   : > { %2589 = vmatprep.subr.bf16.mxu1 %v2652_v57 }
0x1916   : > { %2590 = vmatpush3.bf16.msra.mxu1 %v2124_v47 }
0x19b9   : > { %v2100_v49 = vpop.f32.mrf.mxu1 }
0x19ba   : > { %v2101_v50 = vadd.f32 %v2100_v49, %v2062_v48 }
0x19bb   : > { %v2573_v51 = vpop.f32.mrf.mxu1 }
0x19bc   : > { %v2106_v52 = vmax.f32 %v2101_v50, 0.0 }
0x19bd   : > { %v2103_v57 = vpop.f32.mrf.mxu1 }
0x19be   : > { %v2123_v53 = vpack.c.bf16 %v2106_v52, %v2106_v52 }
0x19bf   : > { %v2574_v54 = vpop.f32.mrf.mxu1 }
0x19c0   : > { %2592 = vmatmul.mubr.bf16.vlgmr.msra.gmra.mxu1 %v2123_v53 }
0x1a80   : > { %v2167_v59 = vpop.f32.mrf.mxu1 }
0x1a81   : > { %v2168_v60 = vadd.f32 %v2167_v59, %v2132_v58 }
0x1a82   : > { %v2593_v61 = vpop.f32.mrf.mxu1 }
0x1a83   : > { %2175 = vperm.xlu0 %2613, %v2168_v60  }
0x1a84   : > { %v2170_v62 = vpop.f32.mrf.mxu1 }
0x1a86   : > { %v2594_v63 = vpop.f32.mrf.mxu1 }
0x1afe   : > { %v2176_v0 = vpop.permute.xlu0 %2175 }
0x1aff   : > { %2178 = vst [vmem:[%s654_s22] sm:$0x1] %v2176_v0 }
0x1b00 PF: > { %s33_s26 = sadd.s32 1, %s2650_s26  }
0x1b01   : > { %p30_p4 = scmp.ge.s32.totalorder %s33_s26, 4  }
0x1b03   :  { %32 = sbr.rel (!%p30_p4) target bundleno = 7 (0x7), region = 146 }

</bundles_post_ra>
